<compile_context>
chip_gen: v5e
topology: v5e:2x2
jax: 0.10.0
libtpu: 0.0.40
codegen_flags: <defaults>
</compile_context>

<pallas_src>
import functools

import jax
import jax.numpy as jnp
from jax.experimental import pallas as pl
from jax.experimental.pallas import tpu as pltpu


# Number of (1, D) bias / LN-gamma/beta rows packed into the constant slab
# (after the cls row and the learned-query rows).
_N_VEC_ROWS = 13


# ---------------------------------------------------------------------------
# Small in-kernel helpers
# ---------------------------------------------------------------------------

def _mm(a, b):
    return jnp.dot(a, b, preferred_element_type=jnp.float32)


def _mm_nt(a, b):
    # a @ b.T without materializing the transpose (contract dim 1 of both).
    return jax.lax.dot_general(a, b, (((1,), (1,)), ((), ())),
                               preferred_element_type=jnp.float32)


def _softmax_rows(s):
    # Exact softmax (review: exported attentions must sum to 1).
    m = jnp.max(s, axis=-1, keepdims=True)
    p = jnp.exp(s - m)
    return p / jnp.sum(p, axis=-1, keepdims=True)


def _layernorm(x, g, b, eps):
    mean = jnp.mean(x, axis=-1, keepdims=True)
    var = jnp.mean(jnp.square(x - mean), axis=-1, keepdims=True)
    return (x - mean) * jax.lax.rsqrt(var + eps) * g + b


# ---------------------------------------------------------------------------
# Fused Pallas kernel (one grid step = a block of `Bb` batch elements)
# ---------------------------------------------------------------------------

def _fused_forward_kernel(x_ref, c_ref, w_ref, m1w_ref, m1b_ref, *out_refs,
                          eps, cls_first, s_short, out_attn, out_hidden):
    """Fused forward: seq-shortener + CLS prepend + 1-layer pre-LN encoder.

    Block layout:
      x_ref   : (Bb, S_in, D)         input embeddings
      c_ref   : (1 + s_short + 13, D) constant slab
                [cls | learned queries | ss_q_b ss_k_b ss_v_b ss_o_b |
                 ln1_g ln1_b | q_b k_b v_b ao_b | ln2_g ln2_b | mlp2_b]
      w_ref   : (8*D + MLP, D)        row-stacked D-column weights
                [ss_q ss_k ss_v ss_o | q k v attn_o | mlp2]
      m1w_ref : (D, MLP),  m1b_ref : (1, MLP)
    Outputs (compile-time optional): h1 (always), h0, shortener attn, layer attn.
    """
    it = iter(out_refs)
    h1_ref = next(it)
    h0_ref = next(it) if out_hidden else None
    ss_attn_ref = next(it) if out_attn else None
    la_ref = next(it) if out_attn else None

    bb, _, d = x_ref.shape
    scale = 1.0 / float(d) ** 0.5
    nb = 1 + s_short                     # first bias row in the constant slab

    def wmat(i):                         # i-th (D, D) weight (sublane-aligned rows)
        return w_ref[i * d:(i + 1) * d, :]

    def crow(i):                         # i-th (1, D) constant row
        return c_ref[i:i + 1, :]

    # Grid-invariant values: sliced/loaded once, shared across the batch loop.
    w_ssq, w_ssk, w_ssv, w_sso = wmat(0), wmat(1), wmat(2), wmat(3)
    w_q, w_k, w_v, w_ao = wmat(4), wmat(5), wmat(6), wmat(7)
    w_m2 = w_ref[8 * d:, :]
    m1_w = m1w_ref[...]
    m1_b = m1b_ref[...]

    cls_row = crow(0)                                   # (1, D)
    queries = c_ref[1:1 + s_short, :]                   # (s_short, D)
    b_ssq, b_ssk = crow(nb), crow(nb + 1)
    b_ssv, b_sso = crow(nb + 2), crow(nb + 3)
    g1, be1 = crow(nb + 4), crow(nb + 5)
    b_q, b_k, b_v, b_ao = crow(nb + 6), crow(nb + 7), crow(nb + 8), crow(nb + 9)
    g2, be2 = crow(nb + 10), crow(nb + 11)
    b_m2 = crow(nb + 12)

    # seq_shortener learned-query projection is batch-invariant: compute once.
    q_s = _mm(queries, w_ssq) + b_ssq                   # (s_short, D)

    # Per-batch work, unrolled at trace time (Bb = 1 on v7x, B on v5e/v6e).
    # Everything stays in f32 vregs; each output gets exactly one store.
    for b in range(bb):
        x = x_ref[b].astype(jnp.float32)                # (S_in, D)

        # ---- seq_shortener: learned-query cross-attention pooler ------------
        k = _mm(x, w_ssk) + b_ssk
        v = _mm(x, w_ssv) + b_ssv
        ss_a = _softmax_rows(_mm_nt(q_s, k) * scale)    # (s_short, S_in)
        x_short = _mm(_mm(ss_a, v), w_sso) + b_sso      # (s_short, D)

        # ---- CLS prepend, built in registers (no store/load round trip) -----
        if cls_first:
            h = jnp.concatenate([cls_row, x_short], axis=0)     # (s_short+1, D)
        else:
            h = jnp.concatenate([x_short, cls_row], axis=0)
        h0 = h

        # ---- 1-layer pre-LN transformer encoder ------------------------------
        # TODO(synk): single-head attention with scale 1/sqrt(D); a multi-head
        # wrapped model would need per-head reshape and 1/sqrt(head_dim).
        hn = _layernorm(h, g1, be1, eps)
        qh = _mm(hn, w_q) + b_q
        kh = _mm(hn, w_k) + b_k
        vh = _mm(hn, w_v) + b_v
        attn = _softmax_rows(_mm_nt(qh, kh) * scale)    # (s_short+1, s_short+1)
        h = h + _mm(_mm(attn, vh), w_ao) + b_ao

        hn2 = _layernorm(h, g2, be2, eps)
        # TODO(synk): PyTorch nn.GELU defaults to exact erf; tanh-approximate
        # GELU kept for guaranteed Mosaic lowering (reference below matches).
        mlp = jax.nn.gelu(_mm(hn2, m1_w) + m1_b, approximate=True)
        h = h + _mm(mlp, w_m2) + b_m2

        h1_ref[b] = h.astype(h1_ref.dtype)
        if out_hidden:
            h0_ref[b] = h0.astype(h0_ref.dtype)
        if out_attn:
            ss_attn_ref[b] = ss_a.astype(ss_attn_ref.dtype)
            la_ref[b] = attn.astype(la_ref.dtype)


# ---------------------------------------------------------------------------
# Parameters (deterministic, in-script) + one-time packing
# ---------------------------------------------------------------------------

def init_params(key, embed_dim, short_len, mlp_dim):
    ks = iter(jax.random.split(key, 16))

    def dense(din, dout):
        w = jax.random.normal(next(ks), (din, dout), jnp.float32) * (din ** -0.5)
        b = jnp.zeros((1, dout), jnp.float32)
        return (w, b)

    ln = lambda d: (jnp.ones((1, d), jnp.float32), jnp.zeros((1, d), jnp.float32))

    return {
        # nn.Parameter cls: trunc_normal_(empty(1,1,D), mean=0, std=0.2)
        "cls": jax.random.truncated_normal(
            next(ks), -2.0, 2.0, (1, 1, embed_dim), jnp.float32) * 0.2,
        # seq_shortener (learned-query cross-attention pooler)
        "ss_queries": jax.random.normal(
            next(ks), (1, short_len, embed_dim), jnp.float32) * 0.02,
        "ss_q": dense(embed_dim, embed_dim),
        "ss_k": dense(embed_dim, embed_dim),
        "ss_v": dense(embed_dim, embed_dim),
        "ss_o": dense(embed_dim, embed_dim),
        # transformer encoder layer (pre-LN)
        "ln1": ln(embed_dim),
        "attn_q": dense(embed_dim, embed_dim),
        "attn_k": dense(embed_dim, embed_dim),
        "attn_v": dense(embed_dim, embed_dim),
        "attn_o": dense(embed_dim, embed_dim),
        "ln2": ln(embed_dim),
        "mlp1": dense(embed_dim, mlp_dim),
        "mlp2": dense(mlp_dim, embed_dim),
    }


def pack_params(params):
    """One-time packing of parameters into DMA-friendly slabs.

    Done once at init (not per forward call) so the kernel has 5 input refs
    instead of 21 and the wrapper issues no per-call concatenations.
    Row order must match the offsets used in `_fused_forward_kernel`.
    """
    const = jnp.concatenate([
        params["cls"][0],                  # (1, D)       row 0
        params["ss_queries"][0],           # (S_short, D)
        params["ss_q"][1], params["ss_k"][1], params["ss_v"][1],
        params["ss_o"][1],
        params["ln1"][0], params["ln1"][1],
        params["attn_q"][1], params["attn_k"][1], params["attn_v"][1],
        params["attn_o"][1],
        params["ln2"][0], params["ln2"][1],
        params["mlp2"][1],
    ], axis=0)                             # (1 + S_short + 13, D)
    w_dd = jnp.concatenate([
        params["ss_q"][0], params["ss_k"][0], params["ss_v"][0],
        params["ss_o"][0],
        params["attn_q"][0], params["attn_k"][0], params["attn_v"][0],
        params["attn_o"][0],
        params["mlp2"][0],                 # (MLP, D)
    ], axis=0)                             # (8*D + MLP, D)
    return {"const": const, "w_dd": w_dd,
            "mlp1_w": params["mlp1"][0], "mlp1_b": params["mlp1"][1]}


# ---------------------------------------------------------------------------
# AdaptedModel.forward — one fused pallas_call
# ---------------------------------------------------------------------------

def _default_batch_block(batch):
    """Generation-aware batch blocking.

    v7x has 2 TensorCores per chip -> keep a 2-step "parallel" grid (one batch
    element per core).  v5e/v6e are single-TC -> fold the whole batch into one
    grid step (the batch loop is unrolled in-kernel, no per-step overhead).
    """
    try:
        kind = jax.devices()[0].device_kind.lower()
    except Exception:
        kind = ""
    if ("v7" in kind or "7x" in kind) and batch % 2 == 0:
        return max(1, batch // 2)
    return batch


def adapted_model_forward(packed, x, output_attentions=True,
                          output_hidden_states=True, cls_first=True,
                          eps=1e-5, batch_block=None):
    if isinstance(x, (tuple, list)):
        x = x[0]
    B, S_in, D = x.shape
    const, w_dd = packed["const"], packed["w_dd"]
    m1_w, m1_b = packed["mlp1_w"], packed["mlp1_b"]
    S_short = const.shape[0] - 1 - _N_VEC_ROWS
    S1 = S_short + 1
    MLP = m1_w.shape[1]

    Bb = batch_block or _default_batch_block(B)
    if B % Bb:
        Bb = B
    grid = (B // Bb,)

    kernel = functools.partial(
        _fused_forward_kernel, eps=eps, cls_first=cls_first, s_short=S_short,
        out_attn=output_attentions, out_hidden=output_hidden_states)

    def invariant(shape):
        n = len(shape)
        return pl.BlockSpec(shape, lambda i, _n=n: (0,) * _n)

    def per_batch(s, d):
        return pl.BlockSpec((Bb, s, d), lambda i: (i, 0, 0))

    in_specs = [
        per_batch(S_in, D),                 # x
        invariant(const.shape),             # cls | queries | biases / LN
        invariant(w_dd.shape),              # row-stacked D-column weights
        invariant(m1_w.shape),              # mlp1 weight
        invariant(m1_b.shape),              # mlp1 bias
    ]

    out_shape = [jax.ShapeDtypeStruct((B, S1, D), x.dtype)]      # last_hidden
    out_specs = [per_batch(S1, D)]
    if output_hidden_states:
        out_shape.append(jax.ShapeDtypeStruct((B, S1, D), x.dtype))   # h0
        out_specs.append(per_batch(S1, D))
    if output_attentions:
        out_shape.append(jax.ShapeDtypeStruct((B, S_short, S_in), jnp.float32))
        out_specs.append(per_batch(S_short, S_in))
        out_shape.append(jax.ShapeDtypeStruct((B, S1, S1), jnp.float32))
        out_specs.append(per_batch(S1, S1))

    results = pl.pallas_call(
        kernel,
        out_shape=tuple(out_shape),
        grid=grid,
        in_specs=in_specs,
        out_specs=tuple(out_specs),
        compiler_params=pltpu.CompilerParams(
            dimension_semantics=("parallel",)),
    )(x, const, w_dd, m1_w, m1_b)

    results = list(results)
    out = {"last_hidden_state": results[0]}
    idx = 1
    if output_hidden_states:
        out["hidden_states"] = (results[idx], results[0])
        idx += 1
    if output_attentions:
        # x['attentions'] = (seq_shortener_attentions, *x['attentions'])
        out["attentions"] = (results[idx], results[idx + 1])
    return out


# ---------------------------------------------------------------------------
# Pure-JAX reference (same synthetic instantiation) for a sanity check
# ---------------------------------------------------------------------------

def reference_forward(params, x, cls_first=True, eps=1e-5):
    B, _, D = x.shape
    scale = 1.0 / float(D) ** 0.5
    with jax.default_matmul_precision("float32"):
        lin = lambda t, wb: t @ wb[0] + wb[1]

        def ln(t, gb):
            m = t.mean(-1, keepdims=True)
            v = ((t - m) ** 2).mean(-1, keepdims=True)
            return (t - m) / jnp.sqrt(v + eps) * gb[0] + gb[1]

        def attn(q, k, v):
            s = jnp.einsum("bqd,bkd->bqk", q, k) * scale
            a = jax.nn.softmax(s, axis=-1)
            return jnp.einsum("bqk,bkd->bqd", a, v), a

        q = jnp.broadcast_to(params["ss_queries"],
                             (B,) + params["ss_queries"].shape[1:])
        ctx, ss_a = attn(lin(q, params["ss_q"]), lin(x, params["ss_k"]),
                         lin(x, params["ss_v"]))
        xs = lin(ctx, params["ss_o"])
        cls = jnp.broadcast_to(params["cls"], (B, 1, D))
        h = (jnp.concatenate([cls, xs], axis=1) if cls_first
             else jnp.concatenate([xs, cls], axis=1))
        h0 = h
        hn = ln(h, params["ln1"])
        ao, la = attn(lin(hn, params["attn_q"]), lin(hn, params["attn_k"]),
                      lin(hn, params["attn_v"]))
        h = h + lin(ao, params["attn_o"])
        hn2 = ln(h, params["ln2"])
        h = h + lin(jax.nn.gelu(lin(hn2, params["mlp1"]), approximate=True),
                    params["mlp2"])
    return h0, h, ss_a, la


# ---------------------------------------------------------------------------

if __name__ == "__main__":
    B, S_IN, S_SHORT, D, MLP = 2, 16, 8, 32, 128

    key = jax.random.PRNGKey(0)
    pkey, xkey = jax.random.split(key)
    params = init_params(pkey, D, S_SHORT, MLP)
    packed = pack_params(params)     # one-time weight packing (not per call)
    x = jax.random.normal(xkey, (B, S_IN, D), jnp.float32)

    out = adapted_model_forward(packed, x,
                                output_attentions=True,
                                output_hidden_states=True,
                                cls_first=True)
    jax.block_until_ready(out["last_hidden_state"])
    jax.block_until_ready(out["attentions"])
    jax.block_until_ready(out["hidden_states"])

    # shape checks (AdaptedModel semantics)
    assert out["last_hidden_state"].shape == (B, S_SHORT + 1, D)
    assert out["attentions"][0].shape == (B, S_SHORT, S_IN)          # shortener
    assert out["attentions"][1].shape == (B, S_SHORT + 1, S_SHORT + 1)
    assert len(out["hidden_states"]) == 2

    # exact softmax: attention rows sum to 1
    assert jnp.allclose(out["attentions"][0].sum(-1), 1.0, atol=1e-5)
    assert jnp.allclose(out["attentions"][1].sum(-1), 1.0, atol=1e-5)

    # numerical check vs. pure-JAX reference (tightened vs. previous 2e-2 now
    # that the softmax is exact; remaining slack covers MXU f32 rounding).
    r_h0, r_h1, r_ssa, r_la = reference_forward(params, x, cls_first=True)
    assert jnp.allclose(out["hidden_states"][0], r_h0, atol=1e-2, rtol=1e-2)
    assert jnp.allclose(out["last_hidden_state"], r_h1, atol=1e-2, rtol=1e-2)
    assert jnp.allclose(out["attentions"][0], r_ssa, atol=1e-2, rtol=1e-2)
    assert jnp.allclose(out["attentions"][1], r_la, atol=1e-2, rtol=1e-2)

    # slim path: no attentions / hidden_states -> fewer outputs, same result
    slim = adapted_model_forward(packed, x, output_attentions=False,
                                 output_hidden_states=False, cls_first=True)
    jax.block_until_ready(slim["last_hidden_state"])
    assert "attentions" not in slim and "hidden_states" not in slim
    assert jnp.allclose(slim["last_hidden_state"], out["last_hidden_state"],
                        atol=1e-6)

    print("KERNEL_OK")
</pallas_src>

<mosaic_0001>
module attributes {stable_mosaic.version = 11 : i64} {
  func.func @_fused_forward_kernel(%arg0: i32, %arg1: memref<2x16x32xf32, #tpu.memory_space<vmem>>, %arg2: memref<22x32xf32, #tpu.memory_space<vmem>>, %arg3: memref<384x32xf32, #tpu.memory_space<vmem>>, %arg4: memref<32x128xf32, #tpu.memory_space<vmem>>, %arg5: memref<1x128xf32, #tpu.memory_space<vmem>>, %arg6: memref<2x9x32xf32, #tpu.memory_space<vmem>>, %arg7: memref<2x9x32xf32, #tpu.memory_space<vmem>>, %arg8: memref<2x8x16xf32, #tpu.memory_space<vmem>>, %arg9: memref<2x9x9xf32, #tpu.memory_space<vmem>>) attributes {dimension_semantics = [#tpu.dimension_semantics<parallel>], iteration_bounds = array<i64: 1>, scalar_prefetch = 0 : i64, scratch_operands = 0 : i64, tpu.core_type = #tpu.core_type<tc>, window_params = [{transform_indices = @transform_0, window_bounds = array<i64: 2, 16, 32>}, {pipeline_mode = #tpu.pipeline_mode<synchronous>, transform_indices = @transform_1, window_bounds = array<i64: 22, 32>}, {pipeline_mode = #tpu.pipeline_mode<synchronous>, transform_indices = @transform_2, window_bounds = array<i64: 384, 32>}, {pipeline_mode = #tpu.pipeline_mode<synchronous>, transform_indices = @transform_3, window_bounds = array<i64: 32, 128>}, {pipeline_mode = #tpu.pipeline_mode<synchronous>, transform_indices = @transform_4, window_bounds = array<i64: 1, 128>}, {transform_indices = @transform_5, window_bounds = array<i64: 2, 9, 32>}, {transform_indices = @transform_6, window_bounds = array<i64: 2, 9, 32>}, {transform_indices = @transform_7, window_bounds = array<i64: 2, 8, 16>}, {transform_indices = @transform_8, window_bounds = array<i64: 2, 9, 9>}]} {
    %c0 = arith.constant 0 : index
    %c0_0 = arith.constant 0 : index
    %0 = vector.load %arg3[%c0, %c0_0] : memref<384x32xf32, #tpu.memory_space<vmem>>, vector<32x32xf32>
    %c32 = arith.constant 32 : index
    %c0_1 = arith.constant 0 : index
    %1 = vector.load %arg3[%c32, %c0_1] : memref<384x32xf32, #tpu.memory_space<vmem>>, vector<32x32xf32>
    %c64 = arith.constant 64 : index
    %c0_2 = arith.constant 0 : index
    %2 = vector.load %arg3[%c64, %c0_2] : memref<384x32xf32, #tpu.memory_space<vmem>>, vector<32x32xf32>
    %c96 = arith.constant 96 : index
    %c0_3 = arith.constant 0 : index
    %3 = vector.load %arg3[%c96, %c0_3] : memref<384x32xf32, #tpu.memory_space<vmem>>, vector<32x32xf32>
    %c128 = arith.constant 128 : index
    %c0_4 = arith.constant 0 : index
    %4 = vector.load %arg3[%c128, %c0_4] : memref<384x32xf32, #tpu.memory_space<vmem>>, vector<32x32xf32>
    %c160 = arith.constant 160 : index
    %c0_5 = arith.constant 0 : index
    %5 = vector.load %arg3[%c160, %c0_5] : memref<384x32xf32, #tpu.memory_space<vmem>>, vector<32x32xf32>
    %c192 = arith.constant 192 : index
    %c0_6 = arith.constant 0 : index
    %6 = vector.load %arg3[%c192, %c0_6] : memref<384x32xf32, #tpu.memory_space<vmem>>, vector<32x32xf32>
    %c224 = arith.constant 224 : index
    %c0_7 = arith.constant 0 : index
    %7 = vector.load %arg3[%c224, %c0_7] : memref<384x32xf32, #tpu.memory_space<vmem>>, vector<32x32xf32>
    %c256 = arith.constant 256 : index
    %c0_8 = arith.constant 0 : index
    %8 = vector.load %arg3[%c256, %c0_8] : memref<384x32xf32, #tpu.memory_space<vmem>>, vector<128x32xf32>
    %c0_9 = arith.constant 0 : index
    %c0_10 = arith.constant 0 : index
    %9 = vector.load %arg4[%c0_9, %c0_10] : memref<32x128xf32, #tpu.memory_space<vmem>>, vector<32x128xf32>
    %c0_11 = arith.constant 0 : index
    %c0_12 = arith.constant 0 : index
    %10 = vector.load %arg5[%c0_11, %c0_12] : memref<1x128xf32, #tpu.memory_space<vmem>>, vector<1x128xf32>
    %c0_13 = arith.constant 0 : index
    %c0_14 = arith.constant 0 : index
    %11 = vector.load %arg2[%c0_13, %c0_14] : memref<22x32xf32, #tpu.memory_space<vmem>>, vector<1x32xf32>
    %c1 = arith.constant 1 : index
    %c0_15 = arith.constant 0 : index
    %12 = vector.load %arg2[%c1, %c0_15] : memref<22x32xf32, #tpu.memory_space<vmem>>, vector<8x32xf32>
    %c9 = arith.constant 9 : index
    %c0_16 = arith.constant 0 : index
    %13 = vector.load %arg2[%c9, %c0_16] : memref<22x32xf32, #tpu.memory_space<vmem>>, vector<1x32xf32>
    %c10 = arith.constant 10 : index
    %c0_17 = arith.constant 0 : index
    %14 = vector.load %arg2[%c10, %c0_17] : memref<22x32xf32, #tpu.memory_space<vmem>>, vector<1x32xf32>
    %c11 = arith.constant 11 : index
    %c0_18 = arith.constant 0 : index
    %15 = vector.load %arg2[%c11, %c0_18] : memref<22x32xf32, #tpu.memory_space<vmem>>, vector<1x32xf32>
    %c12 = arith.constant 12 : index
    %c0_19 = arith.constant 0 : index
    %16 = vector.load %arg2[%c12, %c0_19] : memref<22x32xf32, #tpu.memory_space<vmem>>, vector<1x32xf32>
    %c13 = arith.constant 13 : index
    %c0_20 = arith.constant 0 : index
    %17 = vector.load %arg2[%c13, %c0_20] : memref<22x32xf32, #tpu.memory_space<vmem>>, vector<1x32xf32>
    %c14 = arith.constant 14 : index
    %c0_21 = arith.constant 0 : index
    %18 = vector.load %arg2[%c14, %c0_21] : memref<22x32xf32, #tpu.memory_space<vmem>>, vector<1x32xf32>
    %c15 = arith.constant 15 : index
    %c0_22 = arith.constant 0 : index
    %19 = vector.load %arg2[%c15, %c0_22] : memref<22x32xf32, #tpu.memory_space<vmem>>, vector<1x32xf32>
    %c16 = arith.constant 16 : index
    %c0_23 = arith.constant 0 : index
    %20 = vector.load %arg2[%c16, %c0_23] : memref<22x32xf32, #tpu.memory_space<vmem>>, vector<1x32xf32>
    %c17 = arith.constant 17 : index
    %c0_24 = arith.constant 0 : index
    %21 = vector.load %arg2[%c17, %c0_24] : memref<22x32xf32, #tpu.memory_space<vmem>>, vector<1x32xf32>
    %c18 = arith.constant 18 : index
    %c0_25 = arith.constant 0 : index
    %22 = vector.load %arg2[%c18, %c0_25] : memref<22x32xf32, #tpu.memory_space<vmem>>, vector<1x32xf32>
    %c19 = arith.constant 19 : index
    %c0_26 = arith.constant 0 : index
    %23 = vector.load %arg2[%c19, %c0_26] : memref<22x32xf32, #tpu.memory_space<vmem>>, vector<1x32xf32>
    %c20 = arith.constant 20 : index
    %c0_27 = arith.constant 0 : index
    %24 = vector.load %arg2[%c20, %c0_27] : memref<22x32xf32, #tpu.memory_space<vmem>>, vector<1x32xf32>
    %c21 = arith.constant 21 : index
    %c0_28 = arith.constant 0 : index
    %25 = vector.load %arg2[%c21, %c0_28] : memref<22x32xf32, #tpu.memory_space<vmem>>, vector<1x32xf32>
    %cst = arith.constant dense<0.000000e+00> : vector<8x32xf32>
    %26 = tpu.matmul %12, %0, %cst {dimension_numbers = #tpu.dot_dimension_numbers<[1], [0], [0], [1], [0, 0, 1, 1], [], []>} : vector<8x32xf32>, vector<32x32xf32>, vector<8x32xf32> -> vector<8x32xf32>
    %27 = vector.broadcast %13 : vector<1x32xf32> to vector<8x32xf32>
    %28 = arith.addf %26, %27 : vector<8x32xf32>
    %c0_29 = arith.constant 0 : index
    %c0_30 = arith.constant 0 : index
    %c0_31 = arith.constant 0 : index
    %29 = vector.load %arg1[%c0_29, %c0_30, %c0_31] : memref<2x16x32xf32, #tpu.memory_space<vmem>>, vector<1x16x32xf32>
    %30 = vector.shape_cast %29 : vector<1x16x32xf32> to vector<16x32xf32>
    %cst_32 = arith.constant dense<0.000000e+00> : vector<16x32xf32>
    %31 = tpu.matmul %30, %1, %cst_32 {dimension_numbers = #tpu.dot_dimension_numbers<[1], [0], [0], [1], [0, 0, 1, 1], [], []>} : vector<16x32xf32>, vector<32x32xf32>, vector<16x32xf32> -> vector<16x32xf32>
    %32 = vector.broadcast %14 : vector<1x32xf32> to vector<16x32xf32>
    %33 = arith.addf %31, %32 : vector<16x32xf32>
    %cst_33 = arith.constant dense<0.000000e+00> : vector<16x32xf32>
    %34 = tpu.matmul %30, %2, %cst_33 {dimension_numbers = #tpu.dot_dimension_numbers<[1], [0], [0], [1], [0, 0, 1, 1], [], []>} : vector<16x32xf32>, vector<32x32xf32>, vector<16x32xf32> -> vector<16x32xf32>
    %35 = vector.broadcast %15 : vector<1x32xf32> to vector<16x32xf32>
    %36 = arith.addf %34, %35 : vector<16x32xf32>
    %cst_34 = arith.constant dense<0.000000e+00> : vector<8x16xf32>
    %37 = tpu.matmul %28, %33, %cst_34 {dimension_numbers = #tpu.dot_dimension_numbers<[1], [1], [0], [0], [0, 0, 1, 0], [], []>} : vector<8x32xf32>, vector<16x32xf32>, vector<8x16xf32> -> vector<8x16xf32>
    %cst_35 = arith.constant 0.176776692 : f32
    %38 = vector.broadcast %cst_35 : f32 to vector<8x16xf32>
    %39 = arith.mulf %37, %38 : vector<8x16xf32>
    %cst_36 = arith.constant dense<0xFF800000> : vector<8xf32>
    %40 = vector.multi_reduction <maximumf>, %39, %cst_36 [1] : vector<8x16xf32> to vector<8xf32>
    %41 = vector.shape_cast %40 : vector<8xf32> to vector<8x1xf32>
    %42 = vector.broadcast %41 : vector<8x1xf32> to vector<8x16xf32>
    %43 = arith.subf %39, %42 : vector<8x16xf32>
    %44 = math.exp %43 : vector<8x16xf32>
    %cst_37 = arith.constant dense<0.000000e+00> : vector<8xf32>
    %45 = vector.multi_reduction <add>, %44, %cst_37 [1] : vector<8x16xf32> to vector<8xf32>
    %46 = vector.shape_cast %45 : vector<8xf32> to vector<8x1xf32>
    %47 = vector.broadcast %46 : vector<8x1xf32> to vector<8x16xf32>
    %48 = arith.divf %44, %47 : vector<8x16xf32>
    %cst_38 = arith.constant dense<0.000000e+00> : vector<8x32xf32>
    %49 = tpu.matmul %48, %36, %cst_38 {dimension_numbers = #tpu.dot_dimension_numbers<[1], [0], [0], [1], [0, 0, 1, 1], [], []>} : vector<8x16xf32>, vector<16x32xf32>, vector<8x32xf32> -> vector<8x32xf32>
    %cst_39 = arith.constant dense<0.000000e+00> : vector<8x32xf32>
    %50 = tpu.matmul %49, %3, %cst_39 {dimension_numbers = #tpu.dot_dimension_numbers<[1], [0], [0], [1], [0, 0, 1, 1], [], []>} : vector<8x32xf32>, vector<32x32xf32>, vector<8x32xf32> -> vector<8x32xf32>
    %51 = vector.broadcast %16 : vector<1x32xf32> to vector<8x32xf32>
    %52 = arith.addf %50, %51 : vector<8x32xf32>
    %53 = tpu.concatenate %11, %52 in 0 : vector<1x32xf32>, vector<8x32xf32> -> vector<9x32xf32>
    %cst_40 = arith.constant dense<0.000000e+00> : vector<9xf32>
    %54 = vector.multi_reduction <add>, %53, %cst_40 [1] : vector<9x32xf32> to vector<9xf32>
    %55 = vector.shape_cast %54 : vector<9xf32> to vector<9x1xf32>
    %cst_41 = arith.constant 3.200000e+01 : f32
    %56 = vector.broadcast %cst_41 : f32 to vector<9x1xf32>
    %57 = arith.divf %55, %56 : vector<9x1xf32>
    %58 = vector.broadcast %57 : vector<9x1xf32> to vector<9x32xf32>
    %59 = arith.subf %53, %58 : vector<9x32xf32>
    %60 = arith.mulf %59, %59 : vector<9x32xf32>
    %cst_42 = arith.constant dense<0.000000e+00> : vector<9xf32>
    %61 = vector.multi_reduction <add>, %60, %cst_42 [1] : vector<9x32xf32> to vector<9xf32>
    %62 = vector.shape_cast %61 : vector<9xf32> to vector<9x1xf32>
    %cst_43 = arith.constant 3.200000e+01 : f32
    %63 = vector.broadcast %cst_43 : f32 to vector<9x1xf32>
    %64 = arith.divf %62, %63 : vector<9x1xf32>
    %65 = vector.broadcast %57 : vector<9x1xf32> to vector<9x32xf32>
    %66 = arith.subf %53, %65 : vector<9x32xf32>
    %cst_44 = arith.constant 9.99999974E-6 : f32
    %67 = vector.broadcast %cst_44 : f32 to vector<9x1xf32>
    %68 = arith.addf %64, %67 : vector<9x1xf32>
    %69 = math.rsqrt %68 : vector<9x1xf32>
    %70 = vector.broadcast %69 : vector<9x1xf32> to vector<9x32xf32>
    %71 = arith.mulf %66, %70 : vector<9x32xf32>
    %72 = vector.broadcast %17 : vector<1x32xf32> to vector<9x32xf32>
    %73 = arith.mulf %71, %72 : vector<9x32xf32>
    %74 = vector.broadcast %18 : vector<1x32xf32> to vector<9x32xf32>
    %75 = arith.addf %73, %74 : vector<9x32xf32>
    %cst_45 = arith.constant dense<0.000000e+00> : vector<9x32xf32>
    %76 = tpu.matmul %75, %4, %cst_45 {dimension_numbers = #tpu.dot_dimension_numbers<[1], [0], [0], [1], [0, 0, 1, 1], [], []>} : vector<9x32xf32>, vector<32x32xf32>, vector<9x32xf32> -> vector<9x32xf32>
    %77 = vector.broadcast %19 : vector<1x32xf32> to vector<9x32xf32>
    %78 = arith.addf %76, %77 : vector<9x32xf32>
    %cst_46 = arith.constant dense<0.000000e+00> : vector<9x32xf32>
    %79 = tpu.matmul %75, %5, %cst_46 {dimension_numbers = #tpu.dot_dimension_numbers<[1], [0], [0], [1], [0, 0, 1, 1], [], []>} : vector<9x32xf32>, vector<32x32xf32>, vector<9x32xf32> -> vector<9x32xf32>
    %80 = vector.broadcast %20 : vector<1x32xf32> to vector<9x32xf32>
    %81 = arith.addf %79, %80 : vector<9x32xf32>
    %cst_47 = arith.constant dense<0.000000e+00> : vector<9x32xf32>
    %82 = tpu.matmul %75, %6, %cst_47 {dimension_numbers = #tpu.dot_dimension_numbers<[1], [0], [0], [1], [0, 0, 1, 1], [], []>} : vector<9x32xf32>, vector<32x32xf32>, vector<9x32xf32> -> vector<9x32xf32>
    %83 = vector.broadcast %21 : vector<1x32xf32> to vector<9x32xf32>
    %84 = arith.addf %82, %83 : vector<9x32xf32>
    %cst_48 = arith.constant dense<0.000000e+00> : vector<9x9xf32>
    %85 = tpu.matmul %78, %81, %cst_48 {dimension_numbers = #tpu.dot_dimension_numbers<[1], [1], [0], [0], [0, 0, 1, 0], [], []>} : vector<9x32xf32>, vector<9x32xf32>, vector<9x9xf32> -> vector<9x9xf32>
    %cst_49 = arith.constant 0.176776692 : f32
    %86 = vector.broadcast %cst_49 : f32 to vector<9x9xf32>
    %87 = arith.mulf %85, %86 : vector<9x9xf32>
    %cst_50 = arith.constant dense<0xFF800000> : vector<9xf32>
    %88 = vector.multi_reduction <maximumf>, %87, %cst_50 [1] : vector<9x9xf32> to vector<9xf32>
    %89 = vector.shape_cast %88 : vector<9xf32> to vector<9x1xf32>
    %90 = vector.broadcast %89 : vector<9x1xf32> to vector<9x9xf32>
    %91 = arith.subf %87, %90 : vector<9x9xf32>
    %92 = math.exp %91 : vector<9x9xf32>
    %cst_51 = arith.constant dense<0.000000e+00> : vector<9xf32>
    %93 = vector.multi_reduction <add>, %92, %cst_51 [1] : vector<9x9xf32> to vector<9xf32>
    %94 = vector.shape_cast %93 : vector<9xf32> to vector<9x1xf32>
    %95 = vector.broadcast %94 : vector<9x1xf32> to vector<9x9xf32>
    %96 = arith.divf %92, %95 : vector<9x9xf32>
    %cst_52 = arith.constant dense<0.000000e+00> : vector<9x32xf32>
    %97 = tpu.matmul %96, %84, %cst_52 {dimension_numbers = #tpu.dot_dimension_numbers<[1], [0], [0], [1], [0, 0, 1, 1], [], []>} : vector<9x9xf32>, vector<9x32xf32>, vector<9x32xf32> -> vector<9x32xf32>
    %cst_53 = arith.constant dense<0.000000e+00> : vector<9x32xf32>
    %98 = tpu.matmul %97, %7, %cst_53 {dimension_numbers = #tpu.dot_dimension_numbers<[1], [0], [0], [1], [0, 0, 1, 1], [], []>} : vector<9x32xf32>, vector<32x32xf32>, vector<9x32xf32> -> vector<9x32xf32>
    %99 = arith.addf %53, %98 : vector<9x32xf32>
    %100 = vector.broadcast %22 : vector<1x32xf32> to vector<9x32xf32>
    %101 = arith.addf %99, %100 : vector<9x32xf32>
    %cst_54 = arith.constant dense<0.000000e+00> : vector<9xf32>
    %102 = vector.multi_reduction <add>, %101, %cst_54 [1] : vector<9x32xf32> to vector<9xf32>
    %103 = vector.shape_cast %102 : vector<9xf32> to vector<9x1xf32>
    %cst_55 = arith.constant 3.200000e+01 : f32
    %104 = vector.broadcast %cst_55 : f32 to vector<9x1xf32>
    %105 = arith.divf %103, %104 : vector<9x1xf32>
    %106 = vector.broadcast %105 : vector<9x1xf32> to vector<9x32xf32>
    %107 = arith.subf %101, %106 : vector<9x32xf32>
    %108 = arith.mulf %107, %107 : vector<9x32xf32>
    %cst_56 = arith.constant dense<0.000000e+00> : vector<9xf32>
    %109 = vector.multi_reduction <add>, %108, %cst_56 [1] : vector<9x32xf32> to vector<9xf32>
    %110 = vector.shape_cast %109 : vector<9xf32> to vector<9x1xf32>
    %cst_57 = arith.constant 3.200000e+01 : f32
    %111 = vector.broadcast %cst_57 : f32 to vector<9x1xf32>
    %112 = arith.divf %110, %111 : vector<9x1xf32>
    %113 = vector.broadcast %105 : vector<9x1xf32> to vector<9x32xf32>
    %114 = arith.subf %101, %113 : vector<9x32xf32>
    %cst_58 = arith.constant 9.99999974E-6 : f32
    %115 = vector.broadcast %cst_58 : f32 to vector<9x1xf32>
    %116 = arith.addf %112, %115 : vector<9x1xf32>
    %117 = math.rsqrt %116 : vector<9x1xf32>
    %118 = vector.broadcast %117 : vector<9x1xf32> to vector<9x32xf32>
    %119 = arith.mulf %114, %118 : vector<9x32xf32>
    %120 = vector.broadcast %23 : vector<1x32xf32> to vector<9x32xf32>
    %121 = arith.mulf %119, %120 : vector<9x32xf32>
    %122 = vector.broadcast %24 : vector<1x32xf32> to vector<9x32xf32>
    %123 = arith.addf %121, %122 : vector<9x32xf32>
    %cst_59 = arith.constant dense<0.000000e+00> : vector<9x128xf32>
    %124 = tpu.matmul %123, %9, %cst_59 {dimension_numbers = #tpu.dot_dimension_numbers<[1], [0], [0], [1], [0, 0, 1, 1], [], []>} : vector<9x32xf32>, vector<32x128xf32>, vector<9x128xf32> -> vector<9x128xf32>
    %125 = vector.broadcast %10 : vector<1x128xf32> to vector<9x128xf32>
    %126 = arith.addf %124, %125 : vector<9x128xf32>
    %127 = arith.mulf %126, %126 : vector<9x128xf32>
    %128 = arith.mulf %126, %127 : vector<9x128xf32>
    %cst_60 = arith.constant 4.471500e-02 : f32
    %129 = vector.broadcast %cst_60 : f32 to vector<9x128xf32>
    %130 = arith.mulf %129, %128 : vector<9x128xf32>
    %131 = arith.addf %126, %130 : vector<9x128xf32>
    %cst_61 = arith.constant 0.797884583 : f32
    %132 = vector.broadcast %cst_61 : f32 to vector<9x128xf32>
    %133 = arith.mulf %132, %131 : vector<9x128xf32>
    %134 = math.tanh %133 : vector<9x128xf32>
    %cst_62 = arith.constant 1.000000e+00 : f32
    %135 = vector.broadcast %cst_62 : f32 to vector<9x128xf32>
    %136 = arith.addf %135, %134 : vector<9x128xf32>
    %cst_63 = arith.constant 5.000000e-01 : f32
    %137 = vector.broadcast %cst_63 : f32 to vector<9x128xf32>
    %138 = arith.mulf %137, %136 : vector<9x128xf32>
    %139 = arith.mulf %126, %138 : vector<9x128xf32>
    %cst_64 = arith.constant dense<0.000000e+00> : vector<9x32xf32>
    %140 = tpu.matmul %139, %8, %cst_64 {dimension_numbers = #tpu.dot_dimension_numbers<[1], [0], [0], [1], [0, 0, 1, 1], [], []>} : vector<9x128xf32>, vector<128x32xf32>, vector<9x32xf32> -> vector<9x32xf32>
    %141 = arith.addf %101, %140 : vector<9x32xf32>
    %142 = vector.broadcast %25 : vector<1x32xf32> to vector<9x32xf32>
    %143 = arith.addf %141, %142 : vector<9x32xf32>
    %c0_65 = arith.constant 0 : index
    %c0_66 = arith.constant 0 : index
    %c0_67 = arith.constant 0 : index
    %144 = vector.load %arg6[%c0_65, %c0_66, %c0_67] : memref<2x9x32xf32, #tpu.memory_space<vmem>>, vector<1x9x32xf32>
    %145 = vector.shape_cast %144 : vector<1x9x32xf32> to vector<9x32xf32>
    %146 = vector.shape_cast %143 : vector<9x32xf32> to vector<1x9x32xf32>
    tpu.vector_store %arg6[%c0_65, %c0_66, %c0_67], %146 {strides = array<i32>} : memref<2x9x32xf32, #tpu.memory_space<vmem>>, vector<1x9x32xf32>,
    %c0_68 = arith.constant 0 : index
    %c0_69 = arith.constant 0 : index
    %c0_70 = arith.constant 0 : index
    %147 = vector.load %arg7[%c0_68, %c0_69, %c0_70] : memref<2x9x32xf32, #tpu.memory_space<vmem>>, vector<1x9x32xf32>
    %148 = vector.shape_cast %147 : vector<1x9x32xf32> to vector<9x32xf32>
    %149 = vector.shape_cast %53 : vector<9x32xf32> to vector<1x9x32xf32>
    tpu.vector_store %arg7[%c0_68, %c0_69, %c0_70], %149 {strides = array<i32>} : memref<2x9x32xf32, #tpu.memory_space<vmem>>, vector<1x9x32xf32>,
    %c0_71 = arith.constant 0 : index
    %c0_72 = arith.constant 0 : index
    %c0_73 = arith.constant 0 : index
    %150 = vector.load %arg8[%c0_71, %c0_72, %c0_73] : memref<2x8x16xf32, #tpu.memory_space<vmem>>, vector<1x8x16xf32>
    %151 = vector.shape_cast %150 : vector<1x8x16xf32> to vector<8x16xf32>
    %152 = vector.shape_cast %48 : vector<8x16xf32> to vector<1x8x16xf32>
    tpu.vector_store %arg8[%c0_71, %c0_72, %c0_73], %152 {strides = array<i32>} : memref<2x8x16xf32, #tpu.memory_space<vmem>>, vector<1x8x16xf32>,
    %c0_74 = arith.constant 0 : index
    %c0_75 = arith.constant 0 : index
    %c0_76 = arith.constant 0 : index
    %153 = vector.load %arg9[%c0_74, %c0_75, %c0_76] : memref<2x9x9xf32, #tpu.memory_space<vmem>>, vector<1x9x9xf32>
    %154 = vector.shape_cast %153 : vector<1x9x9xf32> to vector<9x9xf32>
    %155 = vector.shape_cast %96 : vector<9x9xf32> to vector<1x9x9xf32>
    tpu.vector_store %arg9[%c0_74, %c0_75, %c0_76], %155 {strides = array<i32>} : memref<2x9x9xf32, #tpu.memory_space<vmem>>, vector<1x9x9xf32>,
    %c1_77 = arith.constant 1 : index
    %c0_78 = arith.constant 0 : index
    %c0_79 = arith.constant 0 : index
    %156 = vector.load %arg1[%c1_77, %c0_78, %c0_79] : memref<2x16x32xf32, #tpu.memory_space<vmem>>, vector<1x16x32xf32>
    %157 = vector.shape_cast %156 : vector<1x16x32xf32> to vector<16x32xf32>
    %cst_80 = arith.constant dense<0.000000e+00> : vector<16x32xf32>
    %158 = tpu.matmul %157, %1, %cst_80 {dimension_numbers = #tpu.dot_dimension_numbers<[1], [0], [0], [1], [0, 0, 1, 1], [], []>} : vector<16x32xf32>, vector<32x32xf32>, vector<16x32xf32> -> vector<16x32xf32>
    %159 = vector.broadcast %14 : vector<1x32xf32> to vector<16x32xf32>
    %160 = arith.addf %158, %159 : vector<16x32xf32>
    %cst_81 = arith.constant dense<0.000000e+00> : vector<16x32xf32>
    %161 = tpu.matmul %157, %2, %cst_81 {dimension_numbers = #tpu.dot_dimension_numbers<[1], [0], [0], [1], [0, 0, 1, 1], [], []>} : vector<16x32xf32>, vector<32x32xf32>, vector<16x32xf32> -> vector<16x32xf32>
    %162 = vector.broadcast %15 : vector<1x32xf32> to vector<16x32xf32>
    %163 = arith.addf %161, %162 : vector<16x32xf32>
    %cst_82 = arith.constant dense<0.000000e+00> : vector<8x16xf32>
    %164 = tpu.matmul %28, %160, %cst_82 {dimension_numbers = #tpu.dot_dimension_numbers<[1], [1], [0], [0], [0, 0, 1, 0], [], []>} : vector<8x32xf32>, vector<16x32xf32>, vector<8x16xf32> -> vector<8x16xf32>
    %cst_83 = arith.constant 0.176776692 : f32
    %165 = vector.broadcast %cst_83 : f32 to vector<8x16xf32>
    %166 = arith.mulf %164, %165 : vector<8x16xf32>
    %cst_84 = arith.constant dense<0xFF800000> : vector<8xf32>
    %167 = vector.multi_reduction <maximumf>, %166, %cst_84 [1] : vector<8x16xf32> to vector<8xf32>
    %168 = vector.shape_cast %167 : vector<8xf32> to vector<8x1xf32>
    %169 = vector.broadcast %168 : vector<8x1xf32> to vector<8x16xf32>
    %170 = arith.subf %166, %169 : vector<8x16xf32>
    %171 = math.exp %170 : vector<8x16xf32>
    %cst_85 = arith.constant dense<0.000000e+00> : vector<8xf32>
    %172 = vector.multi_reduction <add>, %171, %cst_85 [1] : vector<8x16xf32> to vector<8xf32>
    %173 = vector.shape_cast %172 : vector<8xf32> to vector<8x1xf32>
    %174 = vector.broadcast %173 : vector<8x1xf32> to vector<8x16xf32>
    %175 = arith.divf %171, %174 : vector<8x16xf32>
    %cst_86 = arith.constant dense<0.000000e+00> : vector<8x32xf32>
    %176 = tpu.matmul %175, %163, %cst_86 {dimension_numbers = #tpu.dot_dimension_numbers<[1], [0], [0], [1], [0, 0, 1, 1], [], []>} : vector<8x16xf32>, vector<16x32xf32>, vector<8x32xf32> -> vector<8x32xf32>
    %cst_87 = arith.constant dense<0.000000e+00> : vector<8x32xf32>
    %177 = tpu.matmul %176, %3, %cst_87 {dimension_numbers = #tpu.dot_dimension_numbers<[1], [0], [0], [1], [0, 0, 1, 1], [], []>} : vector<8x32xf32>, vector<32x32xf32>, vector<8x32xf32> -> vector<8x32xf32>
    %178 = vector.broadcast %16 : vector<1x32xf32> to vector<8x32xf32>
    %179 = arith.addf %177, %178 : vector<8x32xf32>
    %180 = tpu.concatenate %11, %179 in 0 : vector<1x32xf32>, vector<8x32xf32> -> vector<9x32xf32>
    %cst_88 = arith.constant dense<0.000000e+00> : vector<9xf32>
    %181 = vector.multi_reduction <add>, %180, %cst_88 [1] : vector<9x32xf32> to vector<9xf32>
    %182 = vector.shape_cast %181 : vector<9xf32> to vector<9x1xf32>
    %cst_89 = arith.constant 3.200000e+01 : f32
    %183 = vector.broadcast %cst_89 : f32 to vector<9x1xf32>
    %184 = arith.divf %182, %183 : vector<9x1xf32>
    %185 = vector.broadcast %184 : vector<9x1xf32> to vector<9x32xf32>
    %186 = arith.subf %180, %185 : vector<9x32xf32>
    %187 = arith.mulf %186, %186 : vector<9x32xf32>
    %cst_90 = arith.constant dense<0.000000e+00> : vector<9xf32>
    %188 = vector.multi_reduction <add>, %187, %cst_90 [1] : vector<9x32xf32> to vector<9xf32>
    %189 = vector.shape_cast %188 : vector<9xf32> to vector<9x1xf32>
    %cst_91 = arith.constant 3.200000e+01 : f32
    %190 = vector.broadcast %cst_91 : f32 to vector<9x1xf32>
    %191 = arith.divf %189, %190 : vector<9x1xf32>
    %192 = vector.broadcast %184 : vector<9x1xf32> to vector<9x32xf32>
    %193 = arith.subf %180, %192 : vector<9x32xf32>
    %cst_92 = arith.constant 9.99999974E-6 : f32
    %194 = vector.broadcast %cst_92 : f32 to vector<9x1xf32>
    %195 = arith.addf %191, %194 : vector<9x1xf32>
    %196 = math.rsqrt %195 : vector<9x1xf32>
    %197 = vector.broadcast %196 : vector<9x1xf32> to vector<9x32xf32>
    %198 = arith.mulf %193, %197 : vector<9x32xf32>
    %199 = vector.broadcast %17 : vector<1x32xf32> to vector<9x32xf32>
    %200 = arith.mulf %198, %199 : vector<9x32xf32>
    %201 = vector.broadcast %18 : vector<1x32xf32> to vector<9x32xf32>
    %202 = arith.addf %200, %201 : vector<9x32xf32>
    %cst_93 = arith.constant dense<0.000000e+00> : vector<9x32xf32>
    %203 = tpu.matmul %202, %4, %cst_93 {dimension_numbers = #tpu.dot_dimension_numbers<[1], [0], [0], [1], [0, 0, 1, 1], [], []>} : vector<9x32xf32>, vector<32x32xf32>, vector<9x32xf32> -> vector<9x32xf32>
    %204 = vector.broadcast %19 : vector<1x32xf32> to vector<9x32xf32>
    %205 = arith.addf %203, %204 : vector<9x32xf32>
    %cst_94 = arith.constant dense<0.000000e+00> : vector<9x32xf32>
    %206 = tpu.matmul %202, %5, %cst_94 {dimension_numbers = #tpu.dot_dimension_numbers<[1], [0], [0], [1], [0, 0, 1, 1], [], []>} : vector<9x32xf32>, vector<32x32xf32>, vector<9x32xf32> -> vector<9x32xf32>
    %207 = vector.broadcast %20 : vector<1x32xf32> to vector<9x32xf32>
    %208 = arith.addf %206, %207 : vector<9x32xf32>
    %cst_95 = arith.constant dense<0.000000e+00> : vector<9x32xf32>
    %209 = tpu.matmul %202, %6, %cst_95 {dimension_numbers = #tpu.dot_dimension_numbers<[1], [0], [0], [1], [0, 0, 1, 1], [], []>} : vector<9x32xf32>, vector<32x32xf32>, vector<9x32xf32> -> vector<9x32xf32>
    %210 = vector.broadcast %21 : vector<1x32xf32> to vector<9x32xf32>
    %211 = arith.addf %209, %210 : vector<9x32xf32>
    %cst_96 = arith.constant dense<0.000000e+00> : vector<9x9xf32>
    %212 = tpu.matmul %205, %208, %cst_96 {dimension_numbers = #tpu.dot_dimension_numbers<[1], [1], [0], [0], [0, 0, 1, 0], [], []>} : vector<9x32xf32>, vector<9x32xf32>, vector<9x9xf32> -> vector<9x9xf32>
    %cst_97 = arith.constant 0.176776692 : f32
    %213 = vector.broadcast %cst_97 : f32 to vector<9x9xf32>
    %214 = arith.mulf %212, %213 : vector<9x9xf32>
    %cst_98 = arith.constant dense<0xFF800000> : vector<9xf32>
    %215 = vector.multi_reduction <maximumf>, %214, %cst_98 [1] : vector<9x9xf32> to vector<9xf32>
    %216 = vector.shape_cast %215 : vector<9xf32> to vector<9x1xf32>
    %217 = vector.broadcast %216 : vector<9x1xf32> to vector<9x9xf32>
    %218 = arith.subf %214, %217 : vector<9x9xf32>
    %219 = math.exp %218 : vector<9x9xf32>
    %cst_99 = arith.constant dense<0.000000e+00> : vector<9xf32>
    %220 = vector.multi_reduction <add>, %219, %cst_99 [1] : vector<9x9xf32> to vector<9xf32>
    %221 = vector.shape_cast %220 : vector<9xf32> to vector<9x1xf32>
    %222 = vector.broadcast %221 : vector<9x1xf32> to vector<9x9xf32>
    %223 = arith.divf %219, %222 : vector<9x9xf32>
    %cst_100 = arith.constant dense<0.000000e+00> : vector<9x32xf32>
    %224 = tpu.matmul %223, %211, %cst_100 {dimension_numbers = #tpu.dot_dimension_numbers<[1], [0], [0], [1], [0, 0, 1, 1], [], []>} : vector<9x9xf32>, vector<9x32xf32>, vector<9x32xf32> -> vector<9x32xf32>
    %cst_101 = arith.constant dense<0.000000e+00> : vector<9x32xf32>
    %225 = tpu.matmul %224, %7, %cst_101 {dimension_numbers = #tpu.dot_dimension_numbers<[1], [0], [0], [1], [0, 0, 1, 1], [], []>} : vector<9x32xf32>, vector<32x32xf32>, vector<9x32xf32> -> vector<9x32xf32>
    %226 = arith.addf %180, %225 : vector<9x32xf32>
    %227 = vector.broadcast %22 : vector<1x32xf32> to vector<9x32xf32>
    %228 = arith.addf %226, %227 : vector<9x32xf32>
    %cst_102 = arith.constant dense<0.000000e+00> : vector<9xf32>
    %229 = vector.multi_reduction <add>, %228, %cst_102 [1] : vector<9x32xf32> to vector<9xf32>
    %230 = vector.shape_cast %229 : vector<9xf32> to vector<9x1xf32>
    %cst_103 = arith.constant 3.200000e+01 : f32
    %231 = vector.broadcast %cst_103 : f32 to vector<9x1xf32>
    %232 = arith.divf %230, %231 : vector<9x1xf32>
    %233 = vector.broadcast %232 : vector<9x1xf32> to vector<9x32xf32>
    %234 = arith.subf %228, %233 : vector<9x32xf32>
    %235 = arith.mulf %234, %234 : vector<9x32xf32>
    %cst_104 = arith.constant dense<0.000000e+00> : vector<9xf32>
    %236 = vector.multi_reduction <add>, %235, %cst_104 [1] : vector<9x32xf32> to vector<9xf32>
    %237 = vector.shape_cast %236 : vector<9xf32> to vector<9x1xf32>
    %cst_105 = arith.constant 3.200000e+01 : f32
    %238 = vector.broadcast %cst_105 : f32 to vector<9x1xf32>
    %239 = arith.divf %237, %238 : vector<9x1xf32>
    %240 = vector.broadcast %232 : vector<9x1xf32> to vector<9x32xf32>
    %241 = arith.subf %228, %240 : vector<9x32xf32>
    %cst_106 = arith.constant 9.99999974E-6 : f32
    %242 = vector.broadcast %cst_106 : f32 to vector<9x1xf32>
    %243 = arith.addf %239, %242 : vector<9x1xf32>
    %244 = math.rsqrt %243 : vector<9x1xf32>
    %245 = vector.broadcast %244 : vector<9x1xf32> to vector<9x32xf32>
    %246 = arith.mulf %241, %245 : vector<9x32xf32>
    %247 = vector.broadcast %23 : vector<1x32xf32> to vector<9x32xf32>
    %248 = arith.mulf %246, %247 : vector<9x32xf32>
    %249 = vector.broadcast %24 : vector<1x32xf32> to vector<9x32xf32>
    %250 = arith.addf %248, %249 : vector<9x32xf32>
    %cst_107 = arith.constant dense<0.000000e+00> : vector<9x128xf32>
    %251 = tpu.matmul %250, %9, %cst_107 {dimension_numbers = #tpu.dot_dimension_numbers<[1], [0], [0], [1], [0, 0, 1, 1], [], []>} : vector<9x32xf32>, vector<32x128xf32>, vector<9x128xf32> -> vector<9x128xf32>
    %252 = vector.broadcast %10 : vector<1x128xf32> to vector<9x128xf32>
    %253 = arith.addf %251, %252 : vector<9x128xf32>
    %254 = arith.mulf %253, %253 : vector<9x128xf32>
    %255 = arith.mulf %253, %254 : vector<9x128xf32>
    %cst_108 = arith.constant 4.471500e-02 : f32
    %256 = vector.broadcast %cst_108 : f32 to vector<9x128xf32>
    %257 = arith.mulf %256, %255 : vector<9x128xf32>
    %258 = arith.addf %253, %257 : vector<9x128xf32>
    %cst_109 = arith.constant 0.797884583 : f32
    %259 = vector.broadcast %cst_109 : f32 to vector<9x128xf32>
    %260 = arith.mulf %259, %258 : vector<9x128xf32>
    %261 = math.tanh %260 : vector<9x128xf32>
    %cst_110 = arith.constant 1.000000e+00 : f32
    %262 = vector.broadcast %cst_110 : f32 to vector<9x128xf32>
    %263 = arith.addf %262, %261 : vector<9x128xf32>
    %cst_111 = arith.constant 5.000000e-01 : f32
    %264 = vector.broadcast %cst_111 : f32 to vector<9x128xf32>
    %265 = arith.mulf %264, %263 : vector<9x128xf32>
    %266 = arith.mulf %253, %265 : vector<9x128xf32>
    %cst_112 = arith.constant dense<0.000000e+00> : vector<9x32xf32>
    %267 = tpu.matmul %266, %8, %cst_112 {dimension_numbers = #tpu.dot_dimension_numbers<[1], [0], [0], [1], [0, 0, 1, 1], [], []>} : vector<9x128xf32>, vector<128x32xf32>, vector<9x32xf32> -> vector<9x32xf32>
    %268 = arith.addf %228, %267 : vector<9x32xf32>
    %269 = vector.broadcast %25 : vector<1x32xf32> to vector<9x32xf32>
    %270 = arith.addf %268, %269 : vector<9x32xf32>
    %c1_113 = arith.constant 1 : index
    %c0_114 = arith.constant 0 : index
    %c0_115 = arith.constant 0 : index
    %271 = vector.load %arg6[%c1_113, %c0_114, %c0_115] : memref<2x9x32xf32, #tpu.memory_space<vmem>>, vector<1x9x32xf32>
    %272 = vector.shape_cast %271 : vector<1x9x32xf32> to vector<9x32xf32>
    %273 = vector.shape_cast %270 : vector<9x32xf32> to vector<1x9x32xf32>
    tpu.vector_store %arg6[%c1_113, %c0_114, %c0_115], %273 {strides = array<i32>} : memref<2x9x32xf32, #tpu.memory_space<vmem>>, vector<1x9x32xf32>,
    %c1_116 = arith.constant 1 : index
    %c0_117 = arith.constant 0 : index
    %c0_118 = arith.constant 0 : index
    %274 = vector.load %arg7[%c1_116, %c0_117, %c0_118] : memref<2x9x32xf32, #tpu.memory_space<vmem>>, vector<1x9x32xf32>
    %275 = vector.shape_cast %274 : vector<1x9x32xf32> to vector<9x32xf32>
    %276 = vector.shape_cast %180 : vector<9x32xf32> to vector<1x9x32xf32>
    tpu.vector_store %arg7[%c1_116, %c0_117, %c0_118], %276 {strides = array<i32>} : memref<2x9x32xf32, #tpu.memory_space<vmem>>, vector<1x9x32xf32>,
    %c1_119 = arith.constant 1 : index
    %c0_120 = arith.constant 0 : index
    %c0_121 = arith.constant 0 : index
    %277 = vector.load %arg8[%c1_119, %c0_120, %c0_121] : memref<2x8x16xf32, #tpu.memory_space<vmem>>, vector<1x8x16xf32>
    %278 = vector.shape_cast %277 : vector<1x8x16xf32> to vector<8x16xf32>
    %279 = vector.shape_cast %175 : vector<8x16xf32> to vector<1x8x16xf32>
    tpu.vector_store %arg8[%c1_119, %c0_120, %c0_121], %279 {strides = array<i32>} : memref<2x8x16xf32, #tpu.memory_space<vmem>>, vector<1x8x16xf32>,
    %c1_122 = arith.constant 1 : index
    %c0_123 = arith.constant 0 : index
    %c0_124 = arith.constant 0 : index
    %280 = vector.load %arg9[%c1_122, %c0_123, %c0_124] : memref<2x9x9xf32, #tpu.memory_space<vmem>>, vector<1x9x9xf32>
    %281 = vector.shape_cast %280 : vector<1x9x9xf32> to vector<9x9xf32>
    %282 = vector.shape_cast %223 : vector<9x9xf32> to vector<1x9x9xf32>
    tpu.vector_store %arg9[%c1_122, %c0_123, %c0_124], %282 {strides = array<i32>} : memref<2x9x9xf32, #tpu.memory_space<vmem>>, vector<1x9x9xf32>,
    return
  }
  func.func @transform_0(%arg0: i32) -> (i32, i32, i32) {
    %c0_i32 = arith.constant 0 : i32
    %c0_i32_0 = arith.constant 0 : i32
    %c0_i32_1 = arith.constant 0 : i32
    return %arg0, %c0_i32, %c0_i32_0 : i32, i32, i32
  }
  func.func @transform_1(%arg0: i32) -> (i32, i32) {
    %c0_i32 = arith.constant 0 : i32
    %c0_i32_0 = arith.constant 0 : i32
    %c0_i32_1 = arith.constant 0 : i32
    return %c0_i32, %c0_i32_0 : i32, i32
  }
  func.func @transform_2(%arg0: i32) -> (i32, i32) {
    %c0_i32 = arith.constant 0 : i32
    %c0_i32_0 = arith.constant 0 : i32
    %c0_i32_1 = arith.constant 0 : i32
    return %c0_i32, %c0_i32_0 : i32, i32
  }
  func.func @transform_3(%arg0: i32) -> (i32, i32) {
    %c0_i32 = arith.constant 0 : i32
    %c0_i32_0 = arith.constant 0 : i32
    %c0_i32_1 = arith.constant 0 : i32
    return %c0_i32, %c0_i32_0 : i32, i32
  }
  func.func @transform_4(%arg0: i32) -> (i32, i32) {
    %c0_i32 = arith.constant 0 : i32
    %c0_i32_0 = arith.constant 0 : i32
    %c0_i32_1 = arith.constant 0 : i32
    return %c0_i32, %c0_i32_0 : i32, i32
  }
  func.func @transform_5(%arg0: i32) -> (i32, i32, i32) {
    %c0_i32 = arith.constant 0 : i32
    %c0_i32_0 = arith.constant 0 : i32
    %c0_i32_1 = arith.constant 0 : i32
    return %arg0, %c0_i32, %c0_i32_0 : i32, i32, i32
  }
  func.func @transform_6(%arg0: i32) -> (i32, i32, i32) {
    %c0_i32 = arith.constant 0 : i32
    %c0_i32_0 = arith.constant 0 : i32
    %c0_i32_1 = arith.constant 0 : i32
    return %arg0, %c0_i32, %c0_i32_0 : i32, i32, i32
  }
  func.func @transform_7(%arg0: i32) -> (i32, i32, i32) {
    %c0_i32 = arith.constant 0 : i32
    %c0_i32_0 = arith.constant 0 : i32
    %c0_i32_1 = arith.constant 0 : i32
    return %arg0, %c0_i32, %c0_i32_0 : i32, i32, i32
  }
  func.func @transform_8(%arg0: i32) -> (i32, i32, i32) {
    %c0_i32 = arith.constant 0 : i32
    %c0_i32_0 = arith.constant 0 : i32
    %c0_i32_1 = arith.constant 0 : i32
    return %arg0, %c0_i32, %c0_i32_0 : i32, i32, i32
  }
}

</mosaic_0001>

<bundles_post_ra>
// kernel: tpu_custom_call.1
= control target key start
LH: loop header
LB: loop body
LE: loop exit
PB: predicated region body
PF: predicated region fallthrough
CT: control target
= control target key end

     0   :  { %vm94_vm0 = vcmask 261120   ;;  %s2198_s0 = inlined_call_operand.vmem [shape: f32[2,16,32], index: 0, kind: input, shape index: {}]   ;;  %s2199_s1 = inlined_call_operand.vmem [shape: f32[22,32], index: 1, kind: input, shape index: {}]   ;;  %s2200_s2 = inlined_call_operand.vmem [shape: f32[384,32], index: 2, kind: input, shape index: {}]   ;;  %s2201_s3 = inlined_call_operand.vmem [shape: f32[32,128], index: 3, kind: input, shape index: {}]   ;;  %s2202_s4 = inlined_call_operand.vmem [shape: f32[1,128], index: 4, kind: input, shape index: {}]   ;;  %s2203_s5 = inlined_call_operand.vmem [shape: f32[2,9,32], index: 5, kind: output, shape index: {0}]   ;;  %s2204_s6 = inlined_call_operand.vmem [shape: f32[2,9,32], index: 6, kind: output, shape index: {1}]   ;;  %s2205_s7 = inlined_call_operand.hbm [shape: f32[2,8,16], index: 7, kind: output, shape index: {2}]   ;;  %s2206_s8 = inlined_call_operand.vmem [shape: f32[2,9,9], index: 8, kind: output, shape index: {3}]  }
   0x1   :  { %v28_v0 = vld [vmem:[%s2200_s2 + $0x18] sm:$0xff]  ;;  %v27_v1 = vld [vmem:[%s2200_s2 + $0x10] sm:$0xff]  ;;  %v26_v2 = vld [vmem:[%s2200_s2 + $0x8] sm:$0xff] }
   0x2   :  { %110 = vmatpush.msra.mxu1 %v28_v0  ;;  %v25_v3 = vld [vmem:[%s2200_s2] sm:$0xff]  ;;  %v1519_v5 = vld [vmem:[%s2200_s2 + $0x38] sm:$0xff]  ;;  %v1524_v6 = vld [vmem:[%s2200_s2 + $0x30] sm:$0xff] }
   0x3   :  { %v79_v4 = vld [vmem:[%s2199_s1 + $0x1] sm:$0xff] }
   0x4   :  { %111 = vmatpush.msra.mxu1 %v27_v1 }
   0x6   :  { %112 = vmatpush.msra.mxu1 %v26_v2 }
   0x8   :  { %113 = vmatpush.msra.mxu1 %v25_v3 }
   0x9   :  { %1297 = vmatmul.msk.f32.vlgmr.msra.gmra.mxu1 %vm94_vm0, %v79_v4 }
   0xa   :  { %14 = vsyncpa [#allocation3], 0  ;;  %139 = vmatpush.msrb.mxu1 %v1519_v5  ;;  %v1531_v7 = vld [vmem:[%s2200_s2 + $0x28] sm:$0xff]  ;;  %v1537_v8 = vld [vmem:[%s2200_s2 + $0x20] sm:$0xff]  ;;  %vm204_vm1 = vcmask 130048   ;;  %vm284_vm6 = vcmask 253952  }
   0xb   :  { %v118_v9 = vld [vmem:[%s2198_s0] sm:$0xff]  ;;  %v119_v10 = vld [vmem:[%s2198_s0 + $0x8] sm:$0xff]  ;;  %v1568_v19 = vld [vmem:[%s2200_s2 + $0x58] sm:$0xff]  ;;  %vm279_vm7 = vcmask 1040384   ;;  %v1452_v61 = vmov 32.0   ;;  %vm454_vm15 = vcmask 72704  }
   0xc   :  { %140 = vmatpush.msrb.mxu1 %v1524_v6  ;;  %v1552_v13 = vld [vmem:[%s2199_s1 + $0xa] ss:$0 sm:$0xff]  ;;  %v1362_v16 = vld [vmem:[%s2199_s1 + $0x9] ss:$0 sm:$0xff]  ;;  %v1573_v20 = vld [vmem:[%s2200_s2 + $0x50] sm:$0xff]  ;;  %163 = vmatpush.msra.mxu2 %v1568_v19  ;;  %s1277_s30 = sshll.u32 %s2205_s7, 4  ;;  %s1278_s30 = int_to_ptr.hbm [resolvable:$true] %s1277_s30 }
   0xd   :  { %v1579_v21 = vld [vmem:[%s2200_s2 + $0x48] sm:$0xff]  ;;  %v1585_v22 = vld [vmem:[%s2200_s2 + $0x40] sm:$0xff]  ;;  %v1603_v36 = vld [vmem:[%s2200_s2 + $0x78] sm:$0xff]  ;;  %s1454_s9 = smov 128   ;;  %s1455_s10 = smov 8  }
   0xe   :  { %141 = vmatpush.msrb.mxu1 %v1531_v7  ;;  %164 = vmatpush.msra.mxu2 %v1573_v20  ;;  %v1595_v27 = vld [vmem:[%s2199_s1 + $0xb] ss:$0 sm:$0xff]  ;;  %v1608_v37 = vld [vmem:[%s2200_s2 + $0x70] sm:$0xff]  ;;  %v1623_v51 = vld [vmem:[%s2200_s2 + $0x60] sm:$0xff] }
   0xf   :  { %v1614_v38 = vld [vmem:[%s2200_s2 + $0x68] sm:$0xff]  ;;  %v1636_v56 = vld [vmem:[%s2199_s1] sm:$0x1] }
  0x10   :  { %142 = vmatpush.msrb.mxu1 %v1537_v8  ;;  %165 = vmatpush.msra.mxu2 %v1579_v21  ;;  %v1630_v53 = vld [vmem:[%s2199_s1 + $0xc] ss:$0 sm:$0xff] }
  0x11   :  { %1298 = vmatmul.msk.f32.vlgmr.msrb.gmra.mxu1 %vm94_vm0, %v118_v9 }
  0x12   :  { %166 = vmatpush.msra.mxu2 %v1585_v22 }
  0x13   :  { %1300 = vmatmul.msk.f32.vlgmr.msra.gmra.mxu2 %vm94_vm0, %v118_v9 }
  0x19   :  { %1299 = vmatmul.msk.f32.gmra.mxu1 %vm94_vm0, %v119_v10 }
  0x1b   :  { %1301 = vmatmul.msk.f32.gmra.mxu2 %vm94_vm0, %v119_v10 }
  0x86   :  { %v115_v11 = vpop.f32.mrf.mxu1 }
  0x87   :  { %v1561_v18 = vadd.f32 %v1362_v16, %v115_v11 }
  0x8e   :  { %v144_v12 = vpop.f32.mrf.mxu1 }
  0x8f   :  { %v145_v17 = vadd.f32 %v1552_v13, %v144_v12 }
  0x96   :  { %v147_v14 = vpop.f32.mrf.mxu1  ;;  %v168_v26 = vpop.f32.mrf.mxu2 }
  0x97   :  { %v148_v15 = vadd.f32 %v1552_v13, %v147_v14  ;;  %v169_v31 = vadd.f32 %v1595_v27, %v168_v26  ;;  %v1684_v26 = vld [vmem:[%s2200_s2 + $0xd8] sm:$0xff] }
  0x99   :  { %1302 = vmatpush.xpose.msk.msra.mxu3 %vm94_vm0, %v148_v15 }
  0x9d   :  { %1303 = vmatpush.xpose.msk.msra.mxu3 %vm94_vm0, %v145_v17 }
  0x9e   :  { %v171_v29 = vpop.f32.mrf.mxu2 }
  0x9f   :  { %v172_v32 = vadd.f32 %v1595_v27, %v171_v29  ;;  %v1697_v29 = vld [vmem:[%s2200_s2 + $0x90] sm:$0xff] }
  0xa0   :  { %1304 = vmatmul.msk.f32.vlgmr.msra.gmra.mxu3 %vm94_vm0, %v1561_v18 }
  0xa1   :  { %246 = vmatpush.msrb.mxu2 %v172_v32  ;;  %268 = vmatpush.msrb.mxu3 %v1603_v36  ;;  %v1715_v32 = vld [vmem:[%s2200_s2 + $0x88] sm:$0xff] }
  0xa3   :  { %247 = vmatpush.msrb.mxu2 %v169_v31  ;;  %269 = vmatpush.msrb.mxu3 %v1608_v37  ;;  %v1709_v31 = vld [vmem:[%s2200_s2 + $0xa8] sm:$0xff] }
  0xa5   :  { %270 = vmatpush.msrb.mxu3 %v1614_v38  ;;  %406 = vmatpush.msra.mxu2 %v1684_v26 }
  0xa7   :  { %271 = vmatpush.msrb.mxu3 %v1623_v51 }
 0x123   :  { %v200_v23 = vpop.f32.mrf.mxu3 }
 0x124   :  { %v203_v24 = vmul.f32 0.17677669, %v200_v23 }
 0x126   :  { %v205_v25 = vsel %vm204_vm1, %v203_v24, -inf }
 0x127   :  { %206 = vmax.xlane.f32.xlu0 %v205_v25  ;;  %v1679_v25 = vld [vmem:[%s2200_s2 + $0x98] sm:$0xff] }
 0x128   :  { %358 = vmatpush.msra.mxu0 %v1679_v25 }
 0x12a   :  { %359 = vmatpush.msra.mxu0 %v1697_v29 }
 0x12c   :  { %360 = vmatpush.msra.mxu0 %v1715_v32 }
 0x19a   :  { %v207_v28 = vpop.xlane.xlu0 %206 }
 0x19b   :  { %v208_v30 = vsub.f32 %v203_v24, %v207_v28  ;;  %v1674_v24 = vld [vmem:[%s2200_s2 + $0xb8] sm:$0xff]  ;;  %v1691_v28 = vld [vmem:[%s2200_s2 + $0xb0] sm:$0xff] }
 0x19c   :  { %382 = vmatpush.msra.mxu1 %v1674_v24 }
 0x19d   :  { %v209_v33 = vmul.f32 1.442695, %v208_v30  ;;  %v1702_v30 = vld [vmem:[%s2200_s2 + $0xd0] sm:$0xff] }
 0x19e   :  { %383 = vmatpush.msra.mxu1 %v1691_v28  ;;  %407 = vmatpush.msra.mxu2 %v1702_v30 }
 0x19f   :  { %1376 = vpow2.f32 %v209_v33  ;;  %v1720_v33 = vld [vmem:[%s2200_s2 + $0xc8] sm:$0xff] }
 0x1a0   :  { %384 = vmatpush.msra.mxu1 %v1709_v31  ;;  %408 = vmatpush.msra.mxu2 %v1720_v33 }
 0x1a5   :  { %v1377_v34 = vpop.eup %1376 }
 0x1a6   :  { %v211_v35 = vsel %vm204_vm1, %v1377_v34, 0.0 }
 0x1a7   :  { %212 = vadd.xlane.f32.xlu0 %v211_v35  ;;  %v1733_v35 = vld [vmem:[%s2200_s2 + $0x80] sm:$0xff] }
 0x1a8   :  { %361 = vmatpush.msra.mxu0 %v1733_v35 }
 0x21a   :  { %v213_v39 = vpop.xlane.xlu0 %212 }
 0x21b   :  { %1378 = vrcp.f32 %v213_v39  ;;  %v225_v43 = vand.u32 2147483648, %v213_v39  ;;  %v223_v45 = vand.u32 2147483647, %v213_v39  ;;  %vm219_vm3 = vweird.f32 %v213_v39 }
 0x21c   :  { %1380 = vrcp.f32 %v1452_v61 }
 0x21d   :  { %v226_v47 = vor.u32 1.1754944e-38, %v225_v43  ;;  %vm224_vm5 = vcmp.eq.f32.partialorder %v223_v45, 8.507059e+37 }
 0x221   :  { %v1379_v40 = vpop.eup %1378 }
 0x222   :  { %v215_v41 = vmul.f32 %v1379_v40, %v213_v39  ;;  %vm220_vm2 = vweird.f32 %v1379_v40  ;;  %v1381_v62 = vpop.eup %1380  ;;  %v1738_v39 = vld [vmem:[%s2200_s2 + $0xc0] sm:$0xff] }
 0x223   :  { %vm221_vm4 = vmor %vm219_vm3, %vm220_vm2  ;;  %v289_v63 = vmul.f32 32.0, %v1381_v62  ;;  %vm293_vm8 = vweird.f32 %v1381_v62  ;;  %409 = vmatpush.msra.mxu2 %v1738_v39  ;;  %vm458_vm2 = vcmask 65536  }
 0x224   :  { %v216_v42 = vsub.f32 1.0, %v215_v41 }
 0x225   :  { %v290_v0 = vsub.f32 1.0, %v289_v63  ;;  %v1753_v63 = vld [vmem:[%s2199_s1 + $0xe] ss:$0 sm:$0xff] }
 0x226   :  { %v217_v44 = vmul.f32 %v1379_v40, %v216_v42 }
 0x227   :  { %v291_v1 = vmul.f32 %v1381_v62, %v290_v0 }
 0x228   :  { %v218_v46 = vadd.f32 %v1379_v40, %v217_v44 }
 0x229   :  { %v292_v2 = vadd.f32 %v1381_v62, %v291_v1 }
 0x22a   :  { %v222_v48 = vsel %vm221_vm4, %v1379_v40, %v218_v46 }
 0x22b   :  { %v227_v49 = vsel %vm224_vm5, %v226_v47, %v222_v48  ;;  %v1659_v3 = vsel %vm293_vm8, %v1381_v62, %v292_v2 }
 0x22c   :  { %v228_v50 = vmul.f32 %v1377_v34, %v227_v49  ;;  %v1727_v34 = vld [vmem:[%s2200_s2 + $0xa0] sm:$0xff] }
 0x22d   :  { %385 = vmatpush.msra.mxu1 %v1727_v34 }
 0x22e   :  { %1305 = vmatmul.msk.f32.vlgmr.msrb.gmra.mxu2 %vm204_vm1, %v228_v50  ;;  %702 = vst.msk [vmem:[#allocation2] sm:$0xff] %vm204_vm1, %v228_v50 }
 0x2b1   :  { %v249_v52 = vpop.f32.mrf.mxu2 }
 0x2b2   :  { %1306 = vmatmul.msk.f32.vlgmr.msrb.gmra.mxu3 %vm94_vm0, %v249_v52 }
 0x335   :  { %v273_v54 = vpop.f32.mrf.mxu3 }
 0x336   :  { %v274_v55 = vadd.f32 %v1630_v53, %v273_v54 }
 0x338   :  { %v1638_v57 = vrot.slane %v274_v55, 7 }
 0x33a   :  { %701 = vst.msk [vmem:[%s2204_s6 + $0x8] sm:$0x1] %vm284_vm6, %v1638_v57  ;;  %v1648_v58 = vsel %vm279_vm7, %v1636_v56, %v1638_v57  ;;  %v285_v60 = vsel %vm284_vm6, %v1638_v57, 0.0 }
 0x33b   :  { %v281_v59 = vsel %vm94_vm0, %v1648_v58, 0.0  ;;  %700 = vst.msk [vmem:[%s2204_s6] sm:$0xff] %vm94_vm0, %v1648_v58 }
 0x33c   :  { %282 = vadd.xlane.f32.xlu1 %v281_v59  ;;  %v1748_v59 = vld [vmem:[%s2199_s1 + $0xd] ss:$0 sm:$0xff] }
 0x344   :  { %286 = vadd.xlane.f32.xlu1 %v285_v60 }
 0x3af   :  { %v283_v4 = vpop.xlane.xlu1 %282 }
 0x3b0   :  { %v295_v9 = vmul.f32 %v1659_v3, %v283_v4 }
 0x3b2   :  { %v297_v10 = vsub.f32 %v1648_v58, %v295_v9 }
 0x3b4   :  { %v299_v11 = vmul.f32 %v297_v10, %v297_v10 }
 0x3b6   :  { %v301_v12 = vsel %vm94_vm0, %v299_v11, 0.0 }
 0x3b7   :  { %302 = vadd.xlane.f32.xlu2 %v301_v12  ;;  %v287_v14 = vpop.xlane.xlu1 %286 }
 0x3b8   :  { %v296_v15 = vmul.f32 %v1659_v3, %v287_v14 }
 0x3ba   :  { %v1666_v16 = vsub.f32 %v1638_v57, %v296_v15 }
 0x3bc   :  { %v300_v17 = vmul.f32 %v1666_v16, %v1666_v16 }
 0x3be   :  { %v304_v23 = vsel %vm284_vm6, %v300_v17, 0.0  ;;  %v1769_v17 = vld [vmem:[%s2199_s1 + $0x10] ss:$0 sm:$0xff] }
 0x3bf   :  { %305 = vadd.xlane.f32.xlu2 %v304_v23 }
 0x42a   :  { %v303_v40 = vpop.xlane.xlu2 %302 }
 0x42b   :  { %v307_v41 = vmul.f32 %v303_v40, %v1659_v3 }
 0x42d   :  { %v309_v42 = vadd.f32 1e-05, %v307_v41 }
 0x42f   :  { %1382 = vrsqrt.f32 %v309_v42  ;;  %vm317_vm10 = vweird.f32 %v309_v42 }
 0x432   :  { %v306_v43 = vpop.xlane.xlu2 %305 }
 0x433   :  { %v308_v44 = vmul.f32 %v306_v43, %v1659_v3 }
 0x435   :  { %v1383_v45 = vpop.eup %1382  ;;  %v310_v46 = vadd.f32 1e-05, %v308_v44  ;;  %v1782_v44 = vld [vmem:[%s2199_s1 + $0x11] ss:$0 sm:$0xff] }
 0x436   :  { %v312_v47 = vmul.f32 %v1383_v45, %v309_v42  ;;  %vm318_vm9 = vweird.f32 %v1383_v45  ;;  %v1776_v42 = vld [vmem:[%s2199_s1 + $0xf] ss:$0 sm:$0xff] }
 0x437   :  { %1384 = vrsqrt.f32 %v310_v46  ;;  %vm319_vm11 = vmor %vm317_vm10, %vm318_vm9  ;;  %vm327_vm13 = vweird.f32 %v310_v46 }
 0x438   :  { %v313_v48 = vmul.f32 %v1383_v45, %v312_v47 }
 0x43a   :  { %v314_v49 = vmul.f32 0.5, %v313_v48 }
 0x43c   :  { %v315_v50 = vsub.f32 1.5, %v314_v49 }
 0x43d   :  { %v1385_v52 = vpop.eup %1384 }
 0x43e   :  { %v316_v54 = vmul.f32 %v1383_v45, %v315_v50  ;;  %v322_v55 = vmul.f32 %v1385_v52, %v310_v46  ;;  %vm328_vm12 = vweird.f32 %v1385_v52 }
 0x43f   :  { %vm329_vm14 = vmor %vm327_vm13, %vm328_vm12 }
 0x440   :  { %v320_v60 = vsel %vm319_vm11, %v1383_v45, %v316_v54  ;;  %v323_v61 = vmul.f32 %v1385_v52, %v322_v55 }
 0x441   :  { %v331_v62 = vmul.f32 %v320_v60, %v297_v10 }
 0x442   :  { %v324_v0 = vmul.f32 0.5, %v323_v61 }
 0x443   :  { %v334_v1 = vmul.f32 %v1748_v59, %v331_v62 }
 0x444   :  { %v325_v2 = vsub.f32 1.5, %v324_v0 }
 0x445   :  { %v337_v4 = vadd.f32 %v1753_v63, %v334_v1 }
 0x446   :  { %v326_v9 = vmul.f32 %v1385_v52, %v325_v2 }
 0x447   :  { %1307 = vmatmul.msk.f32.vlgmr.msra.gmra.mxu0 %vm94_vm0, %v337_v4  ;;  %1309 = vmatmul.msk.f32.vlgmr.msra.gmra.mxu1 %vm94_vm0, %v337_v4 }
 0x448   :  { %v330_v10 = vsel %vm329_vm14, %v1385_v52, %v326_v9  ;;  %1311 = vmatmul.msk.f32.vlgmr.msra.gmra.mxu2 %vm94_vm0, %v337_v4 }
 0x449   :  { %v332_v11 = vmul.f32 %v330_v10, %v1666_v16 }
 0x44b   :  { %v335_v12 = vmul.f32 %v1748_v59, %v332_v11  ;;  %v1803_v11 = vld [vmem:[%s2200_s2 + $0xf8] sm:$0xff] }
 0x44c   :  { %554 = vmatpush.msrb.mxu1 %v1803_v11 }
 0x44d   :  { %v338_v14 = vadd.f32 %v1753_v63, %v335_v12  ;;  %v1808_v12 = vld [vmem:[%s2200_s2 + $0xf0] sm:$0xff] }
 0x44e   :  { %555 = vmatpush.msrb.mxu1 %v1808_v12 }
 0x44f   :  { %1308 = vmatmul.msk.f32.gmra.mxu0 %vm94_vm0, %v338_v14  ;;  %1310 = vmatmul.msk.f32.gmra.mxu1 %vm94_vm0, %v338_v14 }
 0x450   :  { %1312 = vmatmul.msk.f32.gmra.mxu2 %vm94_vm0, %v338_v14  ;;  %v1814_v14 = vld [vmem:[%s2200_s2 + $0xe8] sm:$0xff] }
 0x451   :  { %556 = vmatpush.msrb.mxu1 %v1814_v14 }
 0x4c4   :  { %v387_v15 = vpop.f32.mrf.mxu1  ;;  %v363_v41 = vpop.f32.mrf.mxu0 }
 0x4c5   :  { %v388_v43 = vadd.f32 %v1769_v17, %v387_v15  ;;  %v364_v46 = vadd.f32 %v1776_v42, %v363_v41 }
 0x4cb   :  { %v411_v23 = vpop.f32.mrf.mxu2 }
 0x4cc   :  { %v390_v40 = vpop.f32.mrf.mxu1  ;;  %v412_v48 = vadd.f32 %v1782_v44, %v411_v23  ;;  %v366_v49 = vpop.f32.mrf.mxu0  ;;  %v1820_v23 = vld [vmem:[%s2200_s2 + $0xe0] sm:$0xff] }
 0x4cd   :  { %v391_v16 = vadd.f32 %v1769_v17, %v390_v40  ;;  %v367_v50 = vadd.f32 %v1776_v42, %v366_v49  ;;  %557 = vmatpush.msrb.mxu1 %v1820_v23 }
 0x4cf   :  { %1313 = vmatpush.xpose.msk.msra.mxu3 %vm94_vm0, %v391_v16  ;;  %749 = vmatpush.msra.mxu1 %v1568_v19 }
 0x4d1   :  { %750 = vmatpush.msra.mxu1 %v1573_v20 }
 0x4d3   :  { %v414_v45 = vpop.f32.mrf.mxu2  ;;  %1314 = vmatpush.xpose.msk.msra.mxu3 %vm94_vm0, %v388_v43  ;;  %751 = vmatpush.msra.mxu1 %v1579_v21 }
 0x4d4   :  { %v415_v47 = vadd.f32 %v1782_v44, %v414_v45 }
 0x4d5   :  { %752 = vmatpush.msra.mxu1 %v1585_v22 }
 0x4d6   :  { %1317 = vmatpush.msk.msrb.mxu0 %vm279_vm7, %v415_v47  ;;  %1315 = vmatmul.msk.f32.vlgmr.msra.gmra.mxu3 %vm94_vm0, %v364_v46 }
 0x4d8   :  { %528 = vmatpush.msrb.mxu0 %v412_v48 }
 0x4da   :  { %726 = vmatpush.msra.mxu0 %v1519_v5 }
 0x4dc   :  { %727 = vmatpush.msra.mxu0 %v1524_v6 }
 0x4de   :  { %728 = vmatpush.msra.mxu0 %v1531_v7  ;;  %1316 = vmatmul.msk.f32.gmra.mxu3 %vm94_vm0, %v367_v50 }
 0x4e0   :  { %729 = vmatpush.msra.mxu0 %v1537_v8 }
 0x559   :  { %v446_v52 = vpop.f32.mrf.mxu3 }
 0x55a   :  { %v452_v54 = vmul.f32 0.17677669, %v446_v52 }
 0x55c   :  { %v455_v55 = vsel %vm454_vm15, %v452_v54, -inf }
 0x55d   :  { %456 = vmax.xlane.f32.xlu0 %v455_v55 }
 0x561   :  { %v449_v60 = vpop.f32.mrf.mxu3 }
 0x562   :  { %v453_v61 = vmul.f32 0.17677669, %v449_v60 }
 0x564   :  { %v459_v5 = vsel %vm458_vm2, %v453_v61, -inf }
 0x565   :  { %460 = vmax.xlane.f32.xlu1 %v459_v5 }
 0x5d0   :  { %v457_v6 = vpop.xlane.xlu0 %456 }
 0x5d1   :  { %v462_v62 = vsub.f32 %v452_v54, %v457_v6 }
 0x5d3   :  { %v464_v0 = vmul.f32 1.442695, %v462_v62 }
 0x5d5   :  { %1386 = vpow2.f32 %v464_v0 }
 0x5d8   :  { %v461_v7 = vpop.xlane.xlu1 %460 }
 0x5d9   :  { %v463_v1 = vsub.f32 %v453_v61, %v461_v7 }
 0x5db   :  { %v1387_v2 = vpop.eup %1386  ;;  %v466_v8 = vmul.f32 1.442695, %v463_v1 }
 0x5dc   :  { %v468_v4 = vsel %vm454_vm15, %v1387_v2, 0.0 }
 0x5dd   :  { %1388 = vpow2.f32 %v466_v8  ;;  %469 = vadd.xlane.f32.xlu2 %v468_v4  ;;  %v1325_v8 = vld [vmem:[%s2198_s0 + $0x18] sm:$0xff] }
 0x5e3   :  { %v1389_v9 = vpop.eup %1388 }
 0x5e4   :  { %v471_v10 = vsel %vm458_vm2, %v1389_v9, 0.0 }
 0x5e5   :  { %472 = vadd.xlane.f32.xlu0 %v471_v10 }
 0x650   :  { %v470_v15 = vpop.xlane.xlu2 %469 }
 0x651   :  { %1390 = vrcp.f32 %v470_v15  ;;  %v485_v45 = vand.u32 2147483648, %v470_v15  ;;  %v483_v47 = vand.u32 2147483647, %v470_v15  ;;  %vm479_vm4 = vweird.f32 %v470_v15 }
 0x653   :  { %v486_v19 = vor.u32 1.1754944e-38, %v485_v45  ;;  %vm484_vm8 = vcmp.eq.f32.partialorder %v483_v47, 8.507059e+37  ;;  %v1884_v47 = vld [vmem:[%s2201_s3 + $0x18] sm:$0xff] }
 0x654   :  { %641 = vmatpush.msrb.mxu2 %v1884_v47 }
 0x657   :  { %v1391_v40 = vpop.eup %1390 }
 0x658   :  { %v475_v16 = vmul.f32 %v1391_v40, %v470_v15  ;;  %v473_v41 = vpop.xlane.xlu0 %472  ;;  %vm480_vm3 = vweird.f32 %v1391_v40 }
 0x659   :  { %1392 = vrcp.f32 %v473_v41  ;;  %vm481_vm5 = vmor %vm479_vm4, %vm480_vm3  ;;  %v500_v21 = vand.u32 2147483648, %v473_v41  ;;  %v498_v22 = vand.u32 2147483647, %v473_v41  ;;  %vm494_vm10 = vweird.f32 %v473_v41 }
 0x65a   :  { %v476_v43 = vsub.f32 1.0, %v475_v16 }
 0x65b   :  { %v501_v5 = vor.u32 1.1754944e-38, %v500_v21  ;;  %vm499_vm12 = vcmp.eq.f32.partialorder %v498_v22, 8.507059e+37 }
 0x65c   :  { %v477_v46 = vmul.f32 %v1391_v40, %v476_v43 }
 0x65e   :  { %v478_v48 = vadd.f32 %v1391_v40, %v477_v46 }
 0x65f   :  { %v1393_v49 = vpop.eup %1392 }
 0x660   :  { %v490_v20 = vmul.f32 %v1393_v49, %v473_v41  ;;  %v482_v50 = vsel %vm481_vm5, %v1391_v40, %v478_v48  ;;  %vm495_vm9 = vweird.f32 %v1393_v49  ;;  %v1890_v48 = vld [vmem:[%s2201_s3 + $0x10] sm:$0xff] }
 0x661   :  { %v487_v52 = vsel %vm484_vm8, %v486_v19, %v482_v50  ;;  %vm496_vm11 = vmor %vm494_vm10, %vm495_vm9  ;;  %642 = vmatpush.msrb.mxu2 %v1890_v48  ;;  %v1903_v50 = vld [vmem:[%s2201_s3] sm:$0xff] }
 0x662   :  { %v491_v54 = vsub.f32 1.0, %v490_v20  ;;  %v488_v55 = vmul.f32 %v1387_v2, %v487_v52 }
 0x664   :  { %v492_v60 = vmul.f32 %v1393_v49, %v491_v54  ;;  %1318 = vmatmul.msk.f32.vlgmr.msrb.gmra.mxu0 %vm454_vm15, %v488_v55  ;;  %703 = vst.msk [vmem:[%s2206_s8] sm:$0xff] %vm454_vm15, %v488_v55 }
 0x665   :  { %849 = vmatpush.msrb.mxu0 %v1603_v36 }
 0x666   :  { %v493_v61 = vadd.f32 %v1393_v49, %v492_v60 }
 0x667   :  { %850 = vmatpush.msrb.mxu0 %v1608_v37 }
 0x668   :  { %v497_v6 = vsel %vm496_vm11, %v1393_v49, %v493_v61  ;;  %v1896_v49 = vld [vmem:[%s2201_s3 + $0x8] sm:$0xff] }
 0x669   :  { %v502_v62 = vsel %vm499_vm12, %v501_v5, %v497_v6  ;;  %851 = vmatpush.msrb.mxu0 %v1614_v38  ;;  %v1851_v38 = vld [vmem:[%s2199_s1 + $0x12] ss:$0 sm:$0xff]  ;;  %643 = vmatpush.msrb.mxu2 %v1896_v49 }
 0x66a   :  { %v503_v0 = vmul.f32 %v1389_v9, %v502_v62  ;;  %v1919_v62 = vld [vmem:[%s2200_s2 + $0x170] sm:$0xff] }
 0x66b   :  { %852 = vmatpush.msrb.mxu0 %v1623_v51  ;;  %644 = vmatpush.msrb.mxu2 %v1903_v50 }
 0x66c   :  { %1319 = vmatmul.msk.f32.gmra.mxu0 %vm454_vm15, %v503_v0  ;;  %704 = vst.msk [vmem:[%s2206_s8 + $0x8] sm:$0x1] %vm458_vm2, %v503_v0 }
 0x6e1   :  { %v530_v36 = vpop.f32.mrf.mxu0 }
 0x6e2   :  { %1320 = vmatmul.msk.f32.vlgmr.msrb.gmra.mxu1 %vm94_vm0, %v530_v36  ;;  %v1925_v36 = vld [vmem:[%s2200_s2 + $0x168] sm:$0xff] }
 0x6e3   :  { %927 = vmatpush.msrb.mxu1 %v1679_v25 }
 0x6e5   :  { %928 = vmatpush.msrb.mxu1 %v1697_v29 }
 0x6e7   :  { %929 = vmatpush.msrb.mxu1 %v1715_v32 }
 0x6e9   :  { %v533_v37 = vpop.f32.mrf.mxu0  ;;  %930 = vmatpush.msrb.mxu1 %v1733_v35 }
 0x6ea   :  { %1321 = vmatmul.msk.f32.gmra.mxu1 %vm94_vm0, %v533_v37 }
 0x75f   :  { %v559_v51 = vpop.f32.mrf.mxu1 }
 0x760   :  { %v565_v7 = vadd.f32 %v559_v51, %v1648_v58  ;;  %v1324_v58 = vld [vmem:[%s2198_s0 + $0x10] sm:$0xff] }
 0x761   :  { %1326 = vmatmul.msk.f32.vlgmr.msra.gmra.mxu0 %vm94_vm0, %v1324_v58  ;;  %1328 = vmatmul.msk.f32.vlgmr.msra.gmra.mxu1 %vm94_vm0, %v1324_v58 }
 0x762   :  { %v1855_v1 = vadd.f32 %v1851_v38, %v565_v7 }
 0x764   :  { %v570_v25 = vsel %vm94_vm0, %v1855_v1, 0.0 }
 0x765   :  { %571 = vadd.xlane.f32.xlu1 %v570_v25 }
 0x767   :  { %v562_v29 = vpop.f32.mrf.mxu1 }
 0x768   :  { %v566_v32 = vadd.f32 %v562_v29, %v1638_v57 }
 0x769   :  { %1327 = vmatmul.msk.f32.gmra.mxu0 %vm94_vm0, %v1325_v8  ;;  %1329 = vmatmul.msk.f32.gmra.mxu1 %vm94_vm0, %v1325_v8 }
 0x76a   :  { %v1861_v35 = vadd.f32 %v1851_v38, %v566_v32  ;;  %v1932_v32 = vld [vmem:[%s2199_s1 + $0x13] ss:$0 sm:$0xff] }
 0x76c   :  { %v573_v2 = vsel %vm284_vm6, %v1861_v35, 0.0 }
 0x76d   :  { %574 = vadd.xlane.f32.xlu2 %v573_v2 }
 0x7d8   :  { %v572_v57 = vpop.xlane.xlu1 %571 }
 0x7d9   :  { %v576_v4 = vmul.f32 %v572_v57, %v1659_v3  ;;  %v1937_v57 = vld [vmem:[%s2199_s1 + $0x14] ss:$0 sm:$0xff] }
 0x7db   :  { %v578_v9 = vsub.f32 %v1855_v1, %v576_v4 }
 0x7dd   :  { %v580_v10 = vmul.f32 %v578_v9, %v578_v9 }
 0x7de   :  { %v731_v46 = vpop.f32.mrf.mxu0 }
 0x7df   :  { %v582_v15 = vsel %vm94_vm0, %v580_v10, 0.0  ;;  %v732_v52 = vadd.f32 %v1552_v13, %v731_v46 }
 0x7e0   :  { %v575_v40 = vpop.xlane.xlu2 %574  ;;  %583 = vadd.xlane.f32.xlu0 %v582_v15 }
 0x7e1   :  { %v577_v16 = vmul.f32 %v575_v40, %v1659_v3 }
 0x7e3   :  { %v579_v41 = vsub.f32 %v1861_v35, %v577_v16 }
 0x7e5   :  { %v581_v43 = vmul.f32 %v579_v41, %v579_v41 }
 0x7e6   :  { %v734_v19 = vpop.f32.mrf.mxu0 }
 0x7e7   :  { %v585_v45 = vsel %vm284_vm6, %v581_v43, 0.0  ;;  %v735_v20 = vadd.f32 %v1552_v13, %v734_v19  ;;  %v1914_v13 = vld [vmem:[%s2200_s2 + $0x178] sm:$0xff]  ;;  %v1950_v19 = vld [vmem:[%s2200_s2 + $0x160] sm:$0xff] }
 0x7e8   :  { %586 = vadd.xlane.f32.xlu1 %v585_v45  ;;  %670 = vmatpush.msrb.mxu3 %v1914_v13 }
 0x7e9   :  { %1330 = vmatpush.xpose.msk.msra.mxu2 %vm94_vm0, %v735_v20  ;;  %v1962_v20 = vld [vmem:[%s2200_s2 + $0x150] sm:$0xff] }
 0x7ea   :  { %671 = vmatpush.msrb.mxu3 %v1919_v62 }
 0x7ec   :  { %672 = vmatpush.msrb.mxu3 %v1925_v36 }
 0x7ed   :  { %1331 = vmatpush.xpose.msk.msra.mxu2 %vm94_vm0, %v732_v52  ;;  %v1974_v52 = vld [vmem:[%s2200_s2 + $0x140] sm:$0xff] }
 0x7ee   :  { %673 = vmatpush.msrb.mxu3 %v1950_v19 }
 0x853   :  { %v584_v54 = vpop.xlane.xlu0 %583 }
 0x854   :  { %v588_v55 = vmul.f32 %v584_v54, %v1659_v3  ;;  %v1980_v54 = vld [vmem:[%s2200_s2 + $0x138] sm:$0xff] }
 0x856   :  { %v590_v21 = vadd.f32 1e-05, %v588_v55  ;;  %v1986_v55 = vld [vmem:[%s2200_s2 + $0x130] sm:$0xff] }
 0x858   :  { %1394 = vrsqrt.f32 %v590_v21  ;;  %vm598_vm14 = vweird.f32 %v590_v21 }
 0x85b   :  { %v587_v60 = vpop.xlane.xlu1 %586 }
 0x85c   :  { %v589_v22 = vmul.f32 %v587_v60, %v1659_v3  ;;  %v1998_v60 = vld [vmem:[%s2200_s2 + $0x120] sm:$0xff] }
 0x85e   :  { %v1395_v61 = vpop.eup %1394  ;;  %v591_v5 = vadd.f32 1e-05, %v589_v22  ;;  %v2003_v22 = vld [vmem:[%s2200_s2 + $0x118] sm:$0xff] }
 0x85f   :  { %v593_v6 = vmul.f32 %v1395_v61, %v590_v21  ;;  %vm599_vm13 = vweird.f32 %v1395_v61  ;;  %v1991_v21 = vld [vmem:[%s2200_s2 + $0x128] sm:$0xff] }
 0x860   :  { %1396 = vrsqrt.f32 %v591_v5  ;;  %vm600_vm3 = vmor %vm598_vm14, %vm599_vm13  ;;  %vm608_vm5 = vweird.f32 %v591_v5 }
 0x861   :  { %v594_v0 = vmul.f32 %v1395_v61, %v593_v6  ;;  %v2021_v6 = vld [vmem:[%s2200_s2 + $0x100] sm:$0xff] }
 0x863   :  { %v595_v37 = vmul.f32 0.5, %v594_v0  ;;  %v2029_v0 = vld [vmem:[%s2202_s4] ss:$0 sm:$0xff] }
 0x865   :  { %v596_v51 = vsub.f32 1.5, %v595_v37 }
 0x866   :  { %v1397_v7 = vpop.eup %1396 }
 0x867   :  { %v597_v25 = vmul.f32 %v1395_v61, %v596_v51  ;;  %v603_v29 = vmul.f32 %v1397_v7, %v591_v5  ;;  %vm609_vm4 = vweird.f32 %v1397_v7  ;;  %v2015_v5 = vld [vmem:[%s2200_s2 + $0x108] sm:$0xff] }
 0x868   :  { %vm610_vm8 = vmor %vm608_vm5, %vm609_vm4 }
 0x869   :  { %v601_v2 = vsel %vm600_vm3, %v1395_v61, %v597_v25  ;;  %v604_v58 = vmul.f32 %v1397_v7, %v603_v29  ;;  %v2010_v61 = vld [vmem:[%s2200_s2 + $0x110] sm:$0xff] }
 0x86a   :  { %v612_v8 = vmul.f32 %v601_v2, %v578_v9 }
 0x86b   :  { %v605_v4 = vmul.f32 0.5, %v604_v58 }
 0x86c   :  { %v615_v10 = vmul.f32 %v1932_v32, %v612_v8 }
 0x86d   :  { %v606_v15 = vsub.f32 1.5, %v605_v4 }
 0x86e   :  { %v618_v40 = vadd.f32 %v1937_v57, %v615_v10 }
 0x86f   :  { %v607_v16 = vmul.f32 %v1397_v7, %v606_v15 }
 0x870   :  { %1322 = vmatmul.msk.f32.vlgmr.msrb.gmra.mxu2 %vm94_vm0, %v618_v40 }
 0x871   :  { %v611_v43 = vsel %vm610_vm8, %v1397_v7, %v607_v16 }
 0x872   :  { %v613_v45 = vmul.f32 %v611_v43, %v579_v41  ;;  %v1956_v41 = vld [vmem:[%s2200_s2 + $0x158] sm:$0xff] }
 0x873   :  { %674 = vmatpush.msrb.mxu3 %v1956_v41 }
 0x874   :  { %v616_v9 = vmul.f32 %v1932_v32, %v613_v45 }
 0x875   :  { %675 = vmatpush.msrb.mxu3 %v1962_v20 }
 0x876   :  { %v619_v46 = vadd.f32 %v1937_v57, %v616_v9 }
 0x878   :  { %1323 = vmatmul.msk.f32.gmra.mxu2 %vm94_vm0, %v619_v46 }
 0x880   :  { %1332 = vmatmul.msk.f32.vlgmr.msra.gmra.mxu2 %vm94_vm0, %v1561_v18  ;;  %v1968_v18 = vld [vmem:[%s2200_s2 + $0x148] sm:$0xff] }
 0x881   :  { %676 = vmatpush.msrb.mxu3 %v1968_v18 }
 0x883   :  { %677 = vmatpush.msrb.mxu3 %v1974_v52 }
 0x885   :  { %678 = vmatpush.msrb.mxu3 %v1980_v54 }
 0x887   :  { %679 = vmatpush.msrb.mxu3 %v1986_v55 }
 0x889   :  { %680 = vmatpush.msrb.mxu3 %v1991_v21 }
 0x88b   :  { %681 = vmatpush.msrb.mxu3 %v1998_v60 }
 0x88d   :  { %682 = vmatpush.msrb.mxu3 %v2003_v22 }
 0x88f   :  { %683 = vmatpush.msrb.mxu3 %v2010_v61 }
 0x891   :  { %684 = vmatpush.msrb.mxu3 %v2015_v5 }
 0x893   :  { %685 = vmatpush.msrb.mxu3 %v2021_v6 }
 0x895   :  { %973 = vmatpush.msra.mxu3 %v1684_v26 }
 0x897   :  { %974 = vmatpush.msra.mxu3 %v1702_v30 }
 0x899   :  { %975 = vmatpush.msra.mxu3 %v1720_v33 }
 0x89b   :  { %976 = vmatpush.msra.mxu3 %v1738_v39 }
 0x8f3   :  { %v646_v37 = vpop.f32.mrf.mxu2 }
 0x8f4   :  { %v647_v51 = vadd.f32 %v2029_v0, %v646_v37 }
 0x8f6   :  { %v652_v7 = vmul.f32 %v647_v51, %v647_v51 }
 0x8f8   :  { %v654_v25 = vmul.f32 %v652_v7, %v647_v51 }
 0x8fa   :  { %v656_v29 = vmul.f32 0.044715, %v654_v25 }
 0x8fb   :  { %v649_v2 = vpop.f32.mrf.mxu2 }
 0x8fc   :  { %v658_v58 = vadd.f32 %v656_v29, %v647_v51  ;;  %v650_v26 = vadd.f32 %v2029_v0, %v649_v2 }
 0x8fe   :  { %v660_v8 = vmul.f32 0.7978846, %v658_v58  ;;  %v653_v4 = vmul.f32 %v650_v26, %v650_v26 }
 0x900   :  { %1398 = vtanh.f32 %v660_v8  ;;  %v655_v10 = vmul.f32 %v653_v4, %v650_v26  ;;  %v754_v4 = vpop.f32.mrf.mxu1 }
 0x902   :  { %v657_v15 = vmul.f32 0.044715, %v655_v10 }
 0x903   :  { %v783_v30 = vpop.f32.mrf.mxu2 }
 0x904   :  { %v786_v40 = vmul.f32 0.17677669, %v783_v30  ;;  %v659_v33 = vadd.f32 %v657_v15, %v650_v26 }
 0x906   :  { %v1399_v16 = vpop.eup %1398  ;;  %v787_v43 = vsel %vm204_vm1, %v786_v40, -inf  ;;  %v661_v45 = vmul.f32 0.7978846, %v659_v33 }
 0x907   :  { %788 = vmax.xlane.f32.xlu2 %v787_v43  ;;  %v664_v39 = vadd.f32 1.0, %v1399_v16 }
 0x908   :  { %1400 = vtanh.f32 %v661_v45  ;;  %v757_v10 = vpop.f32.mrf.mxu1 }
 0x909   :  { %v666_v9 = vmul.f32 0.5, %v664_v39 }
 0x90b   :  { %v668_v46 = vmul.f32 %v666_v9, %v647_v51 }
 0x90d   :  { %686 = vmatmul.f32.vlgmr.msrb.gmra.mxu3 %v668_v46 }
 0x90e   :  { %v1401_v37 = vpop.eup %1400  ;;  %1200 = vmatpush.msrb.mxu3 %v1884_v47  ;;  %v755_v47 = vadd.f32 %v1595_v27, %v754_v4 }
 0x90f   :  { %v665_v7 = vadd.f32 1.0, %v1401_v37 }
 0x910   :  { %1201 = vmatpush.msrb.mxu3 %v1890_v48  ;;  %v758_v48 = vadd.f32 %v1595_v27, %v757_v10 }
 0x911   :  { %v667_v25 = vmul.f32 0.5, %v665_v7 }
 0x912   :  { %1202 = vmatpush.msrb.mxu3 %v1896_v49  ;;  %828 = vmatpush.msrb.mxu2 %v758_v48  ;;  %v2049_v49 = vld [vmem:[%s2199_s1 + $0x15] ss:$0 sm:$0xff] }
 0x913   :  { %v669_v29 = vmul.f32 %v667_v25, %v650_v26 }
 0x914   :  { %1203 = vmatpush.msrb.mxu3 %v1903_v50  ;;  %829 = vmatpush.msrb.mxu2 %v755_v47 }
 0x915   :  { %689 = vmatmul.f32.gmra.mxu3 %v669_v29 }
 0x916   :  { %950 = vmatpush.msra.mxu2 %v1674_v24 }
 0x918   :  { %951 = vmatpush.msra.mxu2 %v1691_v28 }
 0x91a   :  { %952 = vmatpush.msra.mxu2 %v1709_v31 }
 0x91c   :  { %953 = vmatpush.msra.mxu2 %v1727_v34 }
 0x97a   :  { %v789_v2 = vpop.xlane.xlu2 %788 }
 0x97b   :  { %v790_v58 = vsub.f32 %v786_v40, %v789_v2 }
 0x97d   :  { %v791_v8 = vmul.f32 1.442695, %v790_v58 }
 0x97f   :  { %1402 = vpow2.f32 %v791_v8 }
 0x985   :  { %v1403_v51 = vpop.eup %1402 }
 0x986   :  { %v793_v15 = vsel %vm204_vm1, %v1403_v51, 0.0 }
 0x987   :  { %794 = vadd.xlane.f32.xlu0 %v793_v15 }
 0x990   :  { %v687_v50 = vpop.f32.mrf.mxu3 }
 0x991   :  { %v693_v26 = vadd.f32 %v687_v50, %v1855_v1 }
 0x993   :  { %v696_v27 = vadd.f32 %v2049_v49, %v693_v26 }
 0x995   :  { %698 = vst.msk [vmem:[%s2203_s5] sm:$0xff] %vm94_vm0, %v696_v27 }
 0x998   :  { %v690_v24 = vpop.f32.mrf.mxu3 }
 0x999   :  { %v694_v28 = vadd.f32 %v690_v24, %v1861_v35 }
 0x99b   :  { %v697_v30 = vadd.f32 %v2049_v49, %v694_v28 }
 0x99d   :  { %699 = vst.msk [vmem:[%s2203_s5 + $0x8] sm:$0x1] %vm284_vm6, %v697_v30 }
 0x9fa   :  { %v795_v31 = vpop.xlane.xlu0 %794 }
 0x9fb   :  { %1404 = vrcp.f32 %v795_v31  ;;  %v807_v33 = vand.u32 2147483648, %v795_v31  ;;  %v805_v43 = vand.u32 2147483647, %v795_v31  ;;  %vm801_vm10 = vweird.f32 %v795_v31 }
 0x9fd   :  { %v808_v35 = vor.u32 1.1754944e-38, %v807_v33  ;;  %vm806_vm12 = vcmp.eq.f32.partialorder %v805_v43, 8.507059e+37 }
 0xa01   :  { %v1405_v34 = vpop.eup %1404 }
 0xa02   :  { %v797_v1 = vmul.f32 %v1405_v34, %v795_v31  ;;  %vm802_vm9 = vweird.f32 %v1405_v34 }
 0xa03   :  { %vm803_vm11 = vmor %vm801_vm10, %vm802_vm9 }
 0xa04   :  { %v798_v40 = vsub.f32 1.0, %v797_v1 }
 0xa06   :  { %v799_v16 = vmul.f32 %v1405_v34, %v798_v40 }
 0xa08   :  { %v800_v45 = vadd.f32 %v1405_v34, %v799_v16 }
 0xa0a   :  { %v804_v39 = vsel %vm803_vm11, %v1405_v34, %v800_v45 }
 0xa0b   :  { %v809_v9 = vsel %vm806_vm12, %v808_v35, %v804_v39 }
 0xa0c   :  { %v810_v46 = vmul.f32 %v1403_v51, %v809_v9 }
 0xa0e   :  { %1333 = vmatmul.msk.f32.vlgmr.msrb.gmra.mxu2 %vm204_vm1, %v810_v46  ;;  %1263 = vst.msk [vmem:[#allocation2 + $0x8] sm:$0xff] %vm204_vm1, %v810_v46 }
 0xa0f   :  { %1119 = vmatpush.msrb.mxu2 %v1803_v11 }
 0xa11   :  { %1120 = vmatpush.msrb.mxu2 %v1808_v12 }
 0xa13   :  { %1121 = vmatpush.msrb.mxu2 %v1814_v14 }
 0xa15   :  { %1122 = vmatpush.msrb.mxu2 %v1820_v23 }
 0xa91   :  { %v831_v37 = vpop.f32.mrf.mxu2 }
 0xa92   :  { %1334 = vmatmul.msk.f32.vlgmr.msrb.gmra.mxu0 %vm94_vm0, %v831_v37 }
 0xb0f   :  { %v854_v7 = vpop.f32.mrf.mxu0 }
 0xb10   :  { %v855_v25 = vadd.f32 %v1630_v53, %v854_v7 }
 0xb12   :  { %v2073_v29 = vrot.slane %v855_v25, 7 }
 0xb14   :  { %1355 = vst.msk [vmem:[%s2204_s6 + $0x18] sm:$0x1] %vm284_vm6, %v2073_v29  ;;  %v864_v11 = vsel %vm284_vm6, %v2073_v29, 0.0  ;;  %v2085_v12 = vsel %vm279_vm7, %v1636_v56, %v2073_v29 }
 0xb15   :  { %865 = vadd.xlane.f32.xlu2 %v864_v11  ;;  %v861_v53 = vsel %vm94_vm0, %v2085_v12, 0.0  ;;  %1354 = vst.msk [vmem:[%s2204_s6 + $0x10] sm:$0xff] %vm94_vm0, %v2085_v12 }
 0xb16   :  { %862 = vadd.xlane.f32.xlu1 %v861_v53 }
 0xb88   :  { %v866_v14 = vpop.xlane.xlu2 %865 }
 0xb89   :  { %v868_v23 = vmul.f32 %v866_v14, %v1659_v3  ;;  %v863_v2 = vpop.xlane.xlu1 %862 }
 0xb8a   :  { %v867_v58 = vmul.f32 %v863_v2, %v1659_v3 }
 0xb8b   :  { %v870_v56 = vsub.f32 %v2073_v29, %v868_v23 }
 0xb8c   :  { %v869_v8 = vsub.f32 %v2085_v12, %v867_v58 }
 0xb8d   :  { %v872_v4 = vmul.f32 %v870_v56, %v870_v56 }
 0xb8e   :  { %v871_v51 = vmul.f32 %v869_v8, %v869_v8 }
 0xb8f   :  { %v876_v10 = vsel %vm284_vm6, %v872_v4, 0.0 }
 0xb90   :  { %877 = vadd.xlane.f32.xlu1 %v876_v10  ;;  %v873_v15 = vsel %vm94_vm0, %v871_v51, 0.0 }
 0xb91   :  { %874 = vadd.xlane.f32.xlu0 %v873_v15 }
 0xc03   :  { %v878_v47 = vpop.xlane.xlu1 %877 }
 0xc04   :  { %v880_v48 = vmul.f32 %v878_v47, %v1659_v3  ;;  %v875_v50 = vpop.xlane.xlu0 %874 }
 0xc05   :  { %v879_v26 = vmul.f32 %v875_v50, %v1659_v3 }
 0xc06   :  { %v882_v27 = vadd.f32 1e-05, %v880_v48 }
 0xc07   :  { %v881_v24 = vadd.f32 1e-05, %v879_v26 }
 0xc08   :  { %1406 = vrsqrt.f32 %v882_v27  ;;  %vm899_vm4 = vweird.f32 %v882_v27 }
 0xc09   :  { %1408 = vrsqrt.f32 %v881_v24  ;;  %vm889_vm14 = vweird.f32 %v881_v24 }
 0xc0e   :  { %v1407_v28 = vpop.eup %1406 }
 0xc0f   :  { %v1409_v30 = vpop.eup %1408  ;;  %v894_v31 = vmul.f32 %v1407_v28, %v882_v27  ;;  %vm900_vm13 = vweird.f32 %v1407_v28 }
 0xc10   :  { %v884_v34 = vmul.f32 %v1409_v30, %v881_v24  ;;  %vm890_vm1 = vweird.f32 %v1409_v30  ;;  %vm901_vm5 = vmor %vm899_vm4, %vm900_vm13 }
 0xc11   :  { %v895_v1 = vmul.f32 %v1407_v28, %v894_v31  ;;  %vm891_vm3 = vmor %vm889_vm14, %vm890_vm1 }
 0xc12   :  { %v885_v40 = vmul.f32 %v1409_v30, %v884_v34 }
 0xc13   :  { %v896_v33 = vmul.f32 0.5, %v895_v1 }
 0xc14   :  { %v886_v16 = vmul.f32 0.5, %v885_v40 }
 0xc15   :  { %v897_v43 = vsub.f32 1.5, %v896_v33 }
 0xc16   :  { %v887_v45 = vsub.f32 1.5, %v886_v16 }
 0xc17   :  { %v898_v35 = vmul.f32 %v1407_v28, %v897_v43 }
 0xc18   :  { %v888_v39 = vmul.f32 %v1409_v30, %v887_v45 }
 0xc19   :  { %v902_v37 = vsel %vm901_vm5, %v1407_v28, %v898_v35 }
 0xc1a   :  { %v892_v9 = vsel %vm891_vm3, %v1409_v30, %v888_v39  ;;  %v904_v11 = vmul.f32 %v902_v37, %v870_v56 }
 0xc1b   :  { %v903_v46 = vmul.f32 %v892_v9, %v869_v8 }
 0xc1c   :  { %v906_v53 = vmul.f32 %v1748_v59, %v904_v11 }
 0xc1d   :  { %v905_v7 = vmul.f32 %v1748_v59, %v903_v46 }
 0xc1e   :  { %v908_v14 = vadd.f32 %v1753_v63, %v906_v53 }
 0xc1f   :  { %v907_v25 = vadd.f32 %v1753_v63, %v905_v7 }
 0xc21   :  { %1335 = vmatmul.msk.f32.vlgmr.msrb.gmra.mxu1 %vm94_vm0, %v907_v25  ;;  %1337 = vmatmul.msk.f32.vlgmr.msra.gmra.mxu2 %vm94_vm0, %v907_v25 }
 0xc22   :  { %1339 = vmatmul.msk.f32.vlgmr.msra.gmra.mxu3 %vm94_vm0, %v907_v25 }
 0xc29   :  { %1336 = vmatmul.msk.f32.gmra.mxu1 %vm94_vm0, %v908_v14  ;;  %1338 = vmatmul.msk.f32.gmra.mxu2 %vm94_vm0, %v908_v14 }
 0xc2a   :  { %1340 = vmatmul.msk.f32.gmra.mxu3 %vm94_vm0, %v908_v14 }
 0xc9e   :  { %v932_v51 = vpop.f32.mrf.mxu1 }
 0xc9f   :  { %v933_v10 = vadd.f32 %v1776_v42, %v932_v51 }
 0xca4   :  { %v955_v23 = vpop.f32.mrf.mxu2 }
 0xca5   :  { %v978_v2 = vpop.f32.mrf.mxu3  ;;  %v956_v63 = vadd.f32 %v1769_v17, %v955_v23 }
 0xca6   :  { %v979_v59 = vadd.f32 %v1782_v44, %v978_v2  ;;  %v935_v15 = vpop.f32.mrf.mxu1 }
 0xcac   :  { %v958_v58 = vpop.f32.mrf.mxu2 }
 0xcad   :  { %v959_v56 = vadd.f32 %v1769_v17, %v958_v58  ;;  %v981_v8 = vpop.f32.mrf.mxu3 }
 0xcae   :  { %v982_v4 = vadd.f32 %v1782_v44, %v981_v8  ;;  %v936_v44 = vadd.f32 %v1776_v42, %v935_v15 }
 0xcaf   :  { %1341 = vmatpush.xpose.msk.msra.mxu0 %vm94_vm0, %v959_v56 }
 0xcb0   :  { %1345 = vmatpush.msk.msra.mxu1 %vm279_vm7, %v982_v4 }
 0xcb2   :  { %1093 = vmatpush.msra.mxu1 %v979_v59 }
 0xcb3   :  { %1342 = vmatpush.xpose.msk.msra.mxu0 %vm94_vm0, %v956_v63 }
 0xcb6   :  { %1343 = vmatmul.msk.f32.vlgmr.msra.gmra.mxu0 %vm94_vm0, %v933_v10 }
 0xcb7   :  { %1229 = vmatpush.msrb.mxu0 %v1914_v13 }
 0xcb9   :  { %1230 = vmatpush.msrb.mxu0 %v1919_v62 }
 0xcbb   :  { %1231 = vmatpush.msrb.mxu0 %v1925_v36 }
 0xcbd   :  { %1232 = vmatpush.msrb.mxu0 %v1950_v19 }
 0xcbe   :  { %1344 = vmatmul.msk.f32.gmra.mxu0 %vm94_vm0, %v936_v44 }
 0xcbf   :  { %1233 = vmatpush.msrb.mxu0 %v1956_v41 }
 0xcc1   :  { %1234 = vmatpush.msrb.mxu0 %v1962_v20 }
 0xcc3   :  { %1235 = vmatpush.msrb.mxu0 %v1968_v18 }
 0xcc5   :  { %1236 = vmatpush.msrb.mxu0 %v1974_v52 }
 0xcc7   :  { %1237 = vmatpush.msrb.mxu0 %v1980_v54 }
 0xcc9   :  { %1238 = vmatpush.msrb.mxu0 %v1986_v55 }
 0xccb   :  { %1239 = vmatpush.msrb.mxu0 %v1991_v21 }
 0xccd   :  { %1240 = vmatpush.msrb.mxu0 %v1998_v60 }
 0xccf   :  { %1241 = vmatpush.msrb.mxu0 %v2003_v22 }
 0xcd1   :  { %1242 = vmatpush.msrb.mxu0 %v2010_v61 }
 0xcd3   :  { %1243 = vmatpush.msrb.mxu0 %v2015_v5 }
 0xcd5   :  { %1244 = vmatpush.msrb.mxu0 %v2021_v6 }
 0xd33   :  { %v1013_v17 = vpop.f32.mrf.mxu0 }
 0xd34   :  { %v1019_v42 = vmul.f32 0.17677669, %v1013_v17 }
 0xd36   :  { %v1021_v13 = vsel %vm454_vm15, %v1019_v42, -inf }
 0xd37   :  { %1022 = vmax.xlane.f32.xlu2 %v1021_v13 }
 0xd3b   :  { %v1016_v62 = vpop.f32.mrf.mxu0 }
 0xd3c   :  { %v1020_v36 = vmul.f32 0.17677669, %v1016_v62 }
 0xd3e   :  { %v1024_v19 = vsel %vm458_vm2, %v1020_v36, -inf }
 0xd3f   :  { %1025 = vmax.xlane.f32.xlu0 %v1024_v19 }
 0xdaa   :  { %v1023_v41 = vpop.xlane.xlu2 %1022 }
 0xdab   :  { %v1027_v20 = vsub.f32 %v1019_v42, %v1023_v41 }
 0xdad   :  { %v1029_v18 = vmul.f32 1.442695, %v1027_v20 }
 0xdaf   :  { %1410 = vpow2.f32 %v1029_v18 }
 0xdb2   :  { %v1026_v52 = vpop.xlane.xlu0 %1025 }
 0xdb3   :  { %v1028_v54 = vsub.f32 %v1020_v36, %v1026_v52 }
 0xdb5   :  { %v1411_v55 = vpop.eup %1410  ;;  %v1031_v21 = vmul.f32 1.442695, %v1028_v54 }
 0xdb6   :  { %v1033_v60 = vsel %vm454_vm15, %v1411_v55, 0.0 }
 0xdb7   :  { %1412 = vpow2.f32 %v1031_v21  ;;  %1034 = vadd.xlane.f32.xlu1 %v1033_v60 }
 0xdbd   :  { %v1413_v22 = vpop.eup %1412 }
 0xdbe   :  { %v1036_v61 = vsel %vm458_vm2, %v1413_v22, 0.0 }
 0xdbf   :  { %1037 = vadd.xlane.f32.xlu2 %v1036_v61 }
 0xe2a   :  { %v1035_v5 = vpop.xlane.xlu1 %1034 }
 0xe2b   :  { %1414 = vrcp.f32 %v1035_v5  ;;  %v1050_v26 = vand.u32 2147483648, %v1035_v5  ;;  %v1048_v24 = vand.u32 2147483647, %v1035_v5  ;;  %vm1044_vm8 = vweird.f32 %v1035_v5 }
 0xe2d   :  { %v1051_v31 = vor.u32 1.1754944e-38, %v1050_v26  ;;  %vm1049_vm10 = vcmp.eq.f32.partialorder %v1048_v24, 8.507059e+37 }
 0xe31   :  { %v1415_v6 = vpop.eup %1414 }
 0xe32   :  { %v1040_v47 = vmul.f32 %v1415_v6, %v1035_v5  ;;  %v1038_v48 = vpop.xlane.xlu2 %1037  ;;  %vm1045_vm7 = vweird.f32 %v1415_v6 }
 0xe33   :  { %1416 = vrcp.f32 %v1038_v48  ;;  %vm1046_vm9 = vmor %vm1044_vm8, %vm1045_vm7  ;;  %v1065_v43 = vand.u32 2147483648, %v1038_v48  ;;  %v1063_v35 = vand.u32 2147483647, %v1038_v48  ;;  %vm1059_vm12 = vweird.f32 %v1038_v48 }
 0xe34   :  { %v1041_v50 = vsub.f32 1.0, %v1040_v47 }
 0xe35   :  { %v1066_v9 = vor.u32 1.1754944e-38, %v1065_v43  ;;  %vm1064_vm13 = vcmp.eq.f32.partialorder %v1063_v35, 8.507059e+37 }
 0xe36   :  { %v1042_v27 = vmul.f32 %v1415_v6, %v1041_v50 }
 0xe38   :  { %v1043_v28 = vadd.f32 %v1415_v6, %v1042_v27 }
 0xe39   :  { %v1417_v30 = vpop.eup %1416 }
 0xe3a   :  { %v1047_v34 = vsel %vm1046_vm9, %v1415_v6, %v1043_v28  ;;  %v1055_v1 = vmul.f32 %v1417_v30, %v1038_v48  ;;  %vm1060_vm11 = vweird.f32 %v1417_v30 }
 0xe3b   :  { %v1052_v40 = vsel %vm1049_vm10, %v1051_v31, %v1047_v34  ;;  %vm1061_vm1 = vmor %vm1059_vm12, %vm1060_vm11 }
 0xe3c   :  { %v1056_v33 = vsub.f32 1.0, %v1055_v1  ;;  %v1053_v16 = vmul.f32 %v1411_v55, %v1052_v40 }
 0xe3e   :  { %v1057_v45 = vmul.f32 %v1417_v30, %v1056_v33  ;;  %1346 = vmatmul.msk.f32.vlgmr.msra.gmra.mxu1 %vm454_vm15, %v1053_v16  ;;  %1356 = vst.msk [vmem:[%s2206_s8 + $0x10] sm:$0xff] %vm454_vm15, %v1053_v16 }
 0xe40   :  { %v1058_v39 = vadd.f32 %v1417_v30, %v1057_v45 }
 0xe42   :  { %v1062_v46 = vsel %vm1061_vm1, %v1417_v30, %v1058_v39 }
 0xe43   :  { %v1067_v37 = vsel %vm1064_vm13, %v1066_v9, %v1062_v46 }
 0xe44   :  { %v1068_v7 = vmul.f32 %v1413_v22, %v1067_v37 }
 0xe46   :  { %1347 = vmatmul.msk.f32.gmra.mxu1 %vm454_vm15, %v1068_v7  ;;  %1357 = vst.msk [vmem:[%s2206_s8 + $0x18] sm:$0x1] %vm458_vm2, %v1068_v7  ;;  %s1453_s8 = smov [#allocation2]  }
 0xe47   :  { %s1275_s3 = sshll.u32 %s1453_s8, 4  ;;  %s1276_s3 = int_to_ptr.vmem [resolvable:$true] %s1275_s3 }
 0xe48   :  { %1283 = dma.vmem_to_hbm [thread:$0]  %s1276_s3, 256, %s1278_s30, [#allocation3], %s1454_s9, %s1454_s9, %s1455_s10  }
 0xebb   :  { %v1095_v25 = vpop.f32.mrf.mxu1 }
 0xebc   :  { %1348 = vmatmul.msk.f32.vlgmr.msrb.gmra.mxu2 %vm94_vm0, %v1095_v25 }
 0xec3   :  { %v1098_v11 = vpop.f32.mrf.mxu1 }
 0xec4   :  { %1349 = vmatmul.msk.f32.gmra.mxu2 %vm94_vm0, %v1098_v11 }
 0xf3f   :  { %v1124_v53 = vpop.f32.mrf.mxu2 }
 0xf40   :  { %v1130_v14 = vadd.f32 %v1124_v53, %v2085_v12 }
 0xf42   :  { %v2157_v23 = vadd.f32 %v1851_v38, %v1130_v14 }
 0xf44   :  { %v1134_v2 = vsel %vm94_vm0, %v2157_v23, 0.0 }
 0xf45   :  { %1135 = vadd.xlane.f32.xlu0 %v1134_v2 }
 0xf47   :  { %v1127_v58 = vpop.f32.mrf.mxu2 }
 0xf48   :  { %v1131_v56 = vadd.f32 %v1127_v58, %v2073_v29 }
 0xf4a   :  { %v2163_v8 = vadd.f32 %v1851_v38, %v1131_v56 }
 0xf4c   :  { %v1137_v4 = vsel %vm284_vm6, %v2163_v8, 0.0 }
 0xf4d   :  { %1138 = vadd.xlane.f32.xlu1 %v1137_v4 }
 0xfb8   :  { %v1136_v51 = vpop.xlane.xlu0 %1135 }
 0xfb9   :  { %v1140_v12 = vmul.f32 %v1136_v51, %v1659_v3 }
 0xfbb   :  { %v1142_v59 = vsub.f32 %v2157_v23, %v1140_v12 }
 0xfbd   :  { %v1144_v63 = vmul.f32 %v1142_v59, %v1142_v59 }
 0xfbf   :  { %v1146_v10 = vsel %vm94_vm0, %v1144_v63, 0.0 }
 0xfc0   :  { %1147 = vadd.xlane.f32.xlu2 %v1146_v10  ;;  %v1139_v15 = vpop.xlane.xlu1 %1138 }
 0xfc1   :  { %v1141_v44 = vmul.f32 %v1139_v15, %v1659_v3 }
 0xfc3   :  { %v1143_v29 = vsub.f32 %v2163_v8, %v1141_v44 }
 0xfc5   :  { %v1145_v38 = vmul.f32 %v1143_v29, %v1143_v29 }
 0xfc7   :  { %v1149_v17 = vsel %vm284_vm6, %v1145_v38, 0.0 }
 0xfc8   :  { %1150 = vadd.xlane.f32.xlu0 %v1149_v17 }
0x1033   :  { %v1148_v42 = vpop.xlane.xlu2 %1147 }
0x1034   :  { %v1152_v13 = vmul.f32 %v1148_v42, %v1659_v3 }
0x1036   :  { %v1154_v62 = vadd.f32 1e-05, %v1152_v13 }
0x1038   :  { %1418 = vrsqrt.f32 %v1154_v62  ;;  %vm1162_vm2 = vweird.f32 %v1154_v62 }
0x103b   :  { %v1151_v36 = vpop.xlane.xlu0 %1150 }
0x103c   :  { %v1153_v19 = vmul.f32 %v1151_v36, %v1659_v3 }
0x103e   :  { %v1419_v41 = vpop.eup %1418  ;;  %v1155_v20 = vadd.f32 1e-05, %v1153_v19 }
0x103f   :  { %v1157_v18 = vmul.f32 %v1419_v41, %v1154_v62  ;;  %vm1163_vm15 = vweird.f32 %v1419_v41 }
0x1040   :  { %1420 = vrsqrt.f32 %v1155_v20  ;;  %vm1164_vm14 = vmor %vm1162_vm2, %vm1163_vm15  ;;  %vm1172_vm4 = vweird.f32 %v1155_v20 }
0x1041   :  { %v1158_v52 = vmul.f32 %v1419_v41, %v1157_v18 }
0x1043   :  { %v1159_v54 = vmul.f32 0.5, %v1158_v52 }
0x1045   :  { %v1160_v55 = vsub.f32 1.5, %v1159_v54 }
0x1046   :  { %v1421_v21 = vpop.eup %1420 }
0x1047   :  { %v1161_v60 = vmul.f32 %v1419_v41, %v1160_v55  ;;  %v1167_v22 = vmul.f32 %v1421_v21, %v1155_v20  ;;  %vm1173_vm3 = vweird.f32 %v1421_v21 }
0x1048   :  { %vm1174_vm5 = vmor %vm1172_vm4, %vm1173_vm3 }
0x1049   :  { %v1165_v61 = vsel %vm1164_vm14, %v1419_v41, %v1161_v60  ;;  %v1168_v5 = vmul.f32 %v1421_v21, %v1167_v22 }
0x104a   :  { %v1176_v6 = vmul.f32 %v1165_v61, %v1142_v59 }
0x104b   :  { %v1169_v47 = vmul.f32 0.5, %v1168_v5 }
0x104c   :  { %v1178_v48 = vmul.f32 %v1932_v32, %v1176_v6 }
0x104d   :  { %v1170_v3 = vsub.f32 1.5, %v1169_v47 }
0x104e   :  { %v1180_v50 = vadd.f32 %v1937_v57, %v1178_v48 }
0x104f   :  { %v1171_v26 = vmul.f32 %v1421_v21, %v1170_v3 }
0x1050   :  { %1350 = vmatmul.msk.f32.vlgmr.msrb.gmra.mxu3 %vm94_vm0, %v1180_v50 }
0x1051   :  { %v1175_v27 = vsel %vm1174_vm5, %v1421_v21, %v1171_v26 }
0x1052   :  { %v1177_v24 = vmul.f32 %v1175_v27, %v1143_v29 }
0x1054   :  { %v1179_v28 = vmul.f32 %v1932_v32, %v1177_v24 }
0x1056   :  { %v1181_v30 = vadd.f32 %v1937_v57, %v1179_v28 }
0x1058   :  { %1351 = vmatmul.msk.f32.gmra.mxu3 %vm94_vm0, %v1181_v30 }
0x10d3   :  { %v1205_v31 = vpop.f32.mrf.mxu3 }
0x10d4   :  { %v1206_v34 = vadd.f32 %v2029_v0, %v1205_v31 }
0x10d6   :  { %v1211_v1 = vmul.f32 %v1206_v34, %v1206_v34 }
0x10d8   :  { %v1213_v40 = vmul.f32 %v1211_v1, %v1206_v34 }
0x10da   :  { %v1215_v33 = vmul.f32 0.044715, %v1213_v40 }
0x10db   :  { %v1208_v16 = vpop.f32.mrf.mxu3 }
0x10dc   :  { %v1217_v43 = vadd.f32 %v1215_v33, %v1206_v34  ;;  %v1209_v45 = vadd.f32 %v2029_v0, %v1208_v16 }
0x10de   :  { %v1219_v35 = vmul.f32 0.7978846, %v1217_v43  ;;  %v1212_v39 = vmul.f32 %v1209_v45, %v1209_v45 }
0x10e0   :  { %1422 = vtanh.f32 %v1219_v35  ;;  %v1214_v9 = vmul.f32 %v1212_v39, %v1209_v45 }
0x10e2   :  { %v1216_v46 = vmul.f32 0.044715, %v1214_v9 }
0x10e4   :  { %v1218_v32 = vadd.f32 %v1216_v46, %v1209_v45 }
0x10e6   :  { %v1423_v37 = vpop.eup %1422  ;;  %v1220_v57 = vmul.f32 0.7978846, %v1218_v32 }
0x10e7   :  { %v1223_v7 = vadd.f32 1.0, %v1423_v37 }
0x10e8   :  { %1424 = vtanh.f32 %v1220_v57 }
0x10e9   :  { %v1225_v25 = vmul.f32 0.5, %v1223_v7 }
0x10eb   :  { %v1227_v11 = vmul.f32 %v1225_v25, %v1206_v34 }
0x10ed   :  { %1245 = vmatmul.f32.vlgmr.msrb.gmra.mxu0 %v1227_v11 }
0x10ee   :  { %v1425_v53 = vpop.eup %1424 }
0x10ef   :  { %v1224_v14 = vadd.f32 1.0, %v1425_v53 }
0x10f1   :  { %v1226_v2 = vmul.f32 0.5, %v1224_v14 }
0x10f3   :  { %v1228_v58 = vmul.f32 %v1226_v2, %v1209_v45 }
0x10f5   :  { %1248 = vmatmul.f32.gmra.mxu0 %v1228_v58 }
0x116a   :  { %v1246_v0 = vpop.f32.mrf.mxu0 }
0x116b   :  { %v1252_v56 = vadd.f32 %v1246_v0, %v2157_v23 }
0x116d   :  { %v1254_v4 = vadd.f32 %v2049_v49, %v1252_v56 }
0x116f   :  { %1352 = vst.msk [vmem:[%s2203_s5 + $0x10] sm:$0xff] %vm94_vm0, %v1254_v4 }
0x1172   :  { %v1249_v51 = vpop.f32.mrf.mxu0 }
0x1173   :  { %v1253_v12 = vadd.f32 %v1249_v51, %v2163_v8 }
0x1175   :  { %v1255_v59 = vadd.f32 %v2049_v49, %v1253_v12 }
0x1177   :  { %1353 = vst.msk [vmem:[%s2203_s5 + $0x18] sm:$0x1] %vm284_vm6, %v1255_v59 }
0x1178   :  { %1450 = dma.done.wait [#allocation3], 256  }
0x1179   :  { %1451 = vsyncadd [#allocation3], 4294967040 }
0x117a   :  { %1296 = vsyncpa [#allocation3], 1 }

</bundles_post_ra>
